<compile_context>
chip_gen: v6e
topology: v6e:2x2x1
jax: 0.10.0
libtpu: 0.0.40
codegen_flags: <defaults>
</compile_context>

<pallas_src>
import jax
import jax.numpy as jnp
from jax.experimental import pallas as pl
from jax.experimental.pallas import tpu as pltpu


# ----------------------------------------------------------------------------
# Host-side packing helpers (run once per call; pure layout work).
# ----------------------------------------------------------------------------
def _round8(n):
    return ((n + 7) // 8) * 8


def _pad_rows(a, rows):
    if a.shape[0] < rows:
        a = jnp.concatenate(
            [a, jnp.zeros((rows - a.shape[0], a.shape[1]), a.dtype)], axis=0)
    return a


def _pad_cols(a, cols):
    if a.shape[1] < cols:
        a = jnp.concatenate(
            [a, jnp.zeros((a.shape[0], cols - a.shape[1]), a.dtype)], axis=1)
    return a


def _pad_vec(v, n):
    if v.shape[0] < n:
        v = jnp.concatenate([v, jnp.zeros((n - v.shape[0],), v.dtype)])
    return v


def _gate_cols(w, direction, H):
    """(3H, Din) PyTorch GRU weight -> (Din, 6H) in interleaved column layout
    [r_f r_r z_f z_r n_f n_r]; the other direction's columns are zero."""
    Din = w.shape[1]
    Z = jnp.zeros((Din, H), jnp.float32)
    blocks = []
    for g in range(3):                                        # r, z, n
        wg = jnp.transpose(w[g * H:(g + 1) * H, :]).astype(jnp.float32)
        blocks += ([wg, Z] if direction == 0 else [Z, wg])
    return jnp.concatenate(blocks, axis=1)


def _interleave_bias(bf, br, H):
    parts = []
    for g in range(3):
        parts += [bf[g * H:(g + 1) * H], br[g * H:(g + 1) * H]]
    return jnp.concatenate(parts).astype(jnp.float32)


def _pack_layer(p, H):
    gf_in = _gate_cols(p["w_ih_f"], 0, H)                     # (Din, 6H)
    gr_in = _gate_cols(p["w_ih_r"], 1, H)
    whh = jnp.concatenate(                                    # block-diag (2H, 6H)
        [_gate_cols(p["w_hh_f"], 0, H), _gate_cols(p["w_hh_r"], 1, H)], axis=0)
    b_i = _interleave_bias(p["b_ih_f"], p["b_ih_r"], H)
    b_h = _interleave_bias(p["b_hh_f"], p["b_hh_r"], H)
    mask_rz = jnp.concatenate([jnp.ones((4 * H,), jnp.float32),
                               jnp.zeros((2 * H,), jnp.float32)])
    b_gi = b_i + b_h * mask_rz        # fold b_hh of r,z into the gi bias
    b_hn = b_h * (1.0 - mask_rz)      # b_hn stays inside r*(gh_n + b_hn)
    return gf_in, gr_in, whh, b_gi, b_hn


def _pack_encoder(p1, p2):
    F = p1["w_ih_f"].shape[1]
    H1 = p1["w_hh_f"].shape[1]
    H2 = p2["w_hh_f"].shape[1]
    W = max(6 * H1, 6 * H2)

    g1f, g1r, whh1, b1, bh1 = _pack_layer(p1, H1)
    g2f, g2r, whh2, b2, bh2 = _pack_layer(p2, H2)

    w1_in = jnp.concatenate([g1f, g1r], axis=0)               # (2F, 6H1)
    # layer-2 input weights re-split so gi2 is computed directly from the
    # natural-time and mirrored-time layer-1 scratch slabs (see kernel):
    w2_a = jnp.concatenate([g2f[:H1], g2r[H1:]], axis=0)      # (2H1, 6H2)
    w2_r = jnp.concatenate([g2r[:H1], g2f[H1:]], axis=0)      # (2H1, 6H2)

    sections = [w1_in, whh1, w2_a, w2_r, whh2]
    offs, parts, off = [], [], 0
    for s in sections:
        r = _round8(s.shape[0])
        offs.append(off)
        parts.append(_pad_cols(_pad_rows(s, r), W))
        off += r
    wslab = jnp.concatenate(parts, axis=0).astype(jnp.bfloat16)

    bslab = jnp.stack([_pad_vec(b1, W), _pad_vec(bh1, W),
                       _pad_vec(b2, W), _pad_vec(bh2, W)], axis=0)  # (4, W) f32
    return wslab, bslab, tuple(offs), F, H1, H2


# ----------------------------------------------------------------------------
# Fused encoder kernel (single grid-less pallas_call).
# ----------------------------------------------------------------------------
def _make_kernel(T, B, F2P, H1, H2, offs):
    o_w1, o_hh1, o_w2a, o_w2r, o_hh2 = offs
    C1, C2 = 6 * H1, 6 * H2

    def fused_gru_step(h, gi_s, whh, bhn, H):
        """One fwd+rev fused GRU cell.  h = [h_fwd | h_rev]  (B, 2H) f32."""
        gh = jnp.dot(h.astype(jnp.bfloat16), whh,
                     preferred_element_type=jnp.float32) + bhn
        rz = jax.nn.sigmoid(gi_s[:, :4 * H] + gh[:, :4 * H])
        r = rz[:, :2 * H]
        z = rz[:, 2 * H:]
        n = jnp.tanh(gi_s[:, 4 * H:] + r * gh[:, 4 * H:])
        return (1.0 - z) * n + z * h

    def kernel(x_ref, w_ref, b_ref, hn_ref, a_ref, m_ref):
        # ---- hoisted weight / bias loads (bf16 weights, f32 biases) --------
        w1_in = w_ref[o_w1:o_w1 + F2P, 0:C1]
        whh1 = w_ref[o_hh1:o_hh1 + 2 * H1, 0:C1]
        w2_a = w_ref[o_w2a:o_w2a + 2 * H1, 0:C2]
        w2_r = w_ref[o_w2r:o_w2r + 2 * H1, 0:C2]
        whh2 = w_ref[o_hh2:o_hh2 + 2 * H2, 0:C2]
        b1 = b_ref[0:1, 0:C1]
        bh1 = b_ref[1:2, 0:C1]
        b2 = b_ref[2:3, 0:C2]
        bh2 = b_ref[3:4, 0:C2]

        # ---- layer 1: all T*B input projections in one MXU pass ------------
        # row block s of gi1 = gates for fwd@time s and rev@time T-1-s
        # (the time pairing is baked into x_aug host-side).
        gi1 = jnp.dot(x_ref[...], w1_in, preferred_element_type=jnp.float32) + b1

        h1 = jnp.zeros((B, 2 * H1), jnp.float32)
        for s in range(T):                       # T fused steps (was 2T)
            sr = T - 1 - s
            h1 = fused_gru_step(h1, gi1[s * B:(s + 1) * B, :], whh1, bh1, H1)
            a_ref[s * B:(s + 1) * B, :] = h1     # row q: [out_f[q]     | out_r[T-1-q]]
            m_ref[sr * B:(sr + 1) * B, :] = h1   # row q: [out_f[T-1-q] | out_r[q]]

        # ---- layer 2: hoisted input projection over the two scratch slabs --
        gi2 = (jnp.dot(a_ref[...].astype(jnp.bfloat16), w2_a,
                       preferred_element_type=jnp.float32)
               + jnp.dot(m_ref[...].astype(jnp.bfloat16), w2_r,
                         preferred_element_type=jnp.float32)
               + b2)

        h2 = jnp.zeros((B, 2 * H2), jnp.float32)
        for s in range(T):
            h2 = fused_gru_step(h2, gi2[s * B:(s + 1) * B, :], whh2, bh2, H2)

        # h1 = [h1_fwd | h1_rev], h2 = [h2_fwd | h2_rev] -> exactly
        # torch.cat((hidden_1[0], hidden_1[1], hidden_2[0], hidden_2[1]), 1).
        hn_ref[:, 0:2 * H1] = h1
        hn_ref[:, 2 * H1:2 * H1 + 2 * H2] = h2

    return kernel


def encoder_legacy_forward(inputs, p1, p2):
    """Matches Encoder_LEGACY.forward: (B, T, F) -> (B, 2*H1 + 2*H2)."""
    B, T, F = inputs.shape
    wslab, bslab, offs, Fp, H1, H2 = _pack_encoder(p1, p2)
    assert Fp == F
    F2P = _round8(2 * F)

    # time-paired input rows: row block s = [x[:, s, :] | x[:, T-1-s, :]]
    x_tb = jnp.transpose(inputs.astype(jnp.float32), (1, 0, 2))    # (T, B, F)
    x_aug = jnp.concatenate([x_tb, x_tb[::-1]], axis=-1)           # (T, B, 2F)
    x_aug = x_aug.reshape(T * B, 2 * F)
    if F2P > 2 * F:
        x_aug = jnp.concatenate(
            [x_aug, jnp.zeros((T * B, F2P - 2 * F), x_aug.dtype)], axis=1)
    x_aug = x_aug.astype(jnp.bfloat16)

    vmem = pl.BlockSpec(memory_space=pltpu.MemorySpace.VMEM)
    kernel = _make_kernel(T, B, F2P, H1, H2, offs)
    return pl.pallas_call(
        kernel,
        out_shape=jax.ShapeDtypeStruct((B, 2 * H1 + 2 * H2), jnp.float32),
        in_specs=[vmem, vmem, vmem],
        out_specs=vmem,
        scratch_shapes=[
            pltpu.VMEM((T * B, 2 * H1), jnp.float32),  # layer-1 outs, natural time
            pltpu.VMEM((T * B, 2 * H1), jnp.float32),  # layer-1 outs, mirrored time
        ],
    )(x_aug, wslab, bslab)


# ----------------------------------------------------------------------------
# Pure-JAX reference (lax.scan, f32) for a correctness check.
# ----------------------------------------------------------------------------
def _gru_direction_ref(x_tbd, w_ih, w_hh, b_ih, b_hh):
    H = w_hh.shape[1]

    def step(h, x_t):
        gi = x_t @ w_ih.T + b_ih
        gh = h @ w_hh.T + b_hh
        r = jax.nn.sigmoid(gi[:, :H] + gh[:, :H])
        z = jax.nn.sigmoid(gi[:, H:2 * H] + gh[:, H:2 * H])
        n = jnp.tanh(gi[:, 2 * H:] + r * gh[:, 2 * H:])
        h_new = (1.0 - z) * n + z * h
        return h_new, h_new

    h0 = jnp.zeros((x_tbd.shape[1], H), jnp.float32)
    h_last, outs = jax.lax.scan(step, h0, x_tbd)
    return outs, h_last


def _bidir_ref(x_btd, params):
    x_tbd = jnp.transpose(x_btd, (1, 0, 2))
    out_f, h_f = _gru_direction_ref(
        x_tbd, params["w_ih_f"], params["w_hh_f"], params["b_ih_f"], params["b_hh_f"])
    out_r, h_r = _gru_direction_ref(
        x_tbd[::-1], params["w_ih_r"], params["w_hh_r"], params["b_ih_r"], params["b_hh_r"])
    out_r = out_r[::-1]
    outputs = jnp.concatenate([out_f, out_r], axis=-1)
    return jnp.transpose(outputs, (1, 0, 2)), h_f, h_r


def _encoder_ref(inputs, p1, p2):
    out1, h1_f, h1_r = _bidir_ref(inputs, p1)
    _out2, h2_f, h2_r = _bidir_ref(out1, p2)
    return jnp.concatenate([h1_f, h1_r, h2_f, h2_r], axis=1)


# ----------------------------------------------------------------------------
# Deterministic parameter init (same shapes as nn.GRU, U(-1/sqrt(H), 1/sqrt(H)))
# ----------------------------------------------------------------------------
def init_bidir_gru_params(key, input_size, hidden_size):
    keys = jax.random.split(key, 8)
    lim = 1.0 / jnp.sqrt(jnp.float32(hidden_size))

    def u(k, shape):
        return jax.random.uniform(k, shape, jnp.float32, -lim, lim)

    return {
        "w_ih_f": u(keys[0], (3 * hidden_size, input_size)),
        "w_hh_f": u(keys[1], (3 * hidden_size, hidden_size)),
        "b_ih_f": u(keys[2], (3 * hidden_size,)),
        "b_hh_f": u(keys[3], (3 * hidden_size,)),
        "w_ih_r": u(keys[4], (3 * hidden_size, input_size)),
        "w_hh_r": u(keys[5], (3 * hidden_size, hidden_size)),
        "b_ih_r": u(keys[6], (3 * hidden_size,)),
        "b_hh_r": u(keys[7], (3 * hidden_size,)),
    }


if __name__ == "__main__":
    NUM_FEATURES = 12
    HIDDEN_1 = 32
    HIDDEN_2 = 16
    BATCH = 2
    SEQ = 8

    key = jax.random.PRNGKey(0)
    k_in, k_p1, k_p2 = jax.random.split(key, 3)

    inputs = jax.random.normal(k_in, (BATCH, SEQ, NUM_FEATURES), jnp.float32)
    p1 = init_bidir_gru_params(k_p1, NUM_FEATURES, HIDDEN_1)
    p2 = init_bidir_gru_params(k_p2, 2 * HIDDEN_1, HIDDEN_2)

    h_n = jax.block_until_ready(encoder_legacy_forward(inputs, p1, p2))
    assert h_n.shape == (BATCH, 2 * HIDDEN_1 + 2 * HIDDEN_2), h_n.shape

    h_n_ref = jax.block_until_ready(_encoder_ref(inputs, p1, p2))
    # bf16 matmul operands (f32 accumulation) -> loosened tolerance per review.
    max_err = float(jnp.max(jnp.abs(h_n - h_n_ref)))
    assert jnp.allclose(h_n, h_n_ref, atol=5e-2, rtol=5e-2), max_err

    print("KERNEL_OK")
</pallas_src>

<mosaic_0001>
module attributes {stable_mosaic.version = 11 : i64} {
  func.func @kernel(%arg0: memref<16x24xbf16, #tpu.memory_space<vmem>>, %arg1: memref<248x192xbf16, #tpu.memory_space<vmem>>, %arg2: memref<4x192xf32, #tpu.memory_space<vmem>>, %arg3: memref<2x96xf32, #tpu.memory_space<vmem>>, %arg4: memref<16x64xf32, #tpu.memory_space<vmem>>, %arg5: memref<16x64xf32, #tpu.memory_space<vmem>>) attributes {dimension_semantics = [], scalar_prefetch = 0 : i64, scratch_operands = 2 : i64, tpu.core_type = #tpu.core_type<tc>} {
    %c0 = arith.constant 0 : index
    %c0_0 = arith.constant 0 : index
    %0 = vector.load %arg1[%c0, %c0_0] : memref<248x192xbf16, #tpu.memory_space<vmem>>, vector<24x192xbf16>
    %c24 = arith.constant 24 : index
    %c0_1 = arith.constant 0 : index
    %1 = vector.load %arg1[%c24, %c0_1] : memref<248x192xbf16, #tpu.memory_space<vmem>>, vector<64x192xbf16>
    %c88 = arith.constant 88 : index
    %c0_2 = arith.constant 0 : index
    %2 = vector.load %arg1[%c88, %c0_2] : memref<248x192xbf16, #tpu.memory_space<vmem>>, vector<64x96xbf16>
    %c152 = arith.constant 152 : index
    %c0_3 = arith.constant 0 : index
    %3 = vector.load %arg1[%c152, %c0_3] : memref<248x192xbf16, #tpu.memory_space<vmem>>, vector<64x96xbf16>
    %c216 = arith.constant 216 : index
    %c0_4 = arith.constant 0 : index
    %4 = vector.load %arg1[%c216, %c0_4] : memref<248x192xbf16, #tpu.memory_space<vmem>>, vector<32x96xbf16>
    %c0_5 = arith.constant 0 : index
    %c0_6 = arith.constant 0 : index
    %5 = vector.load %arg2[%c0_5, %c0_6] : memref<4x192xf32, #tpu.memory_space<vmem>>, vector<1x192xf32>
    %c1 = arith.constant 1 : index
    %c0_7 = arith.constant 0 : index
    %6 = vector.load %arg2[%c1, %c0_7] : memref<4x192xf32, #tpu.memory_space<vmem>>, vector<1x192xf32>
    %c2 = arith.constant 2 : index
    %c0_8 = arith.constant 0 : index
    %7 = vector.load %arg2[%c2, %c0_8] : memref<4x192xf32, #tpu.memory_space<vmem>>, vector<1x96xf32>
    %c3 = arith.constant 3 : index
    %c0_9 = arith.constant 0 : index
    %8 = vector.load %arg2[%c3, %c0_9] : memref<4x192xf32, #tpu.memory_space<vmem>>, vector<1x96xf32>
    %c0_10 = arith.constant 0 : index
    %c0_11 = arith.constant 0 : index
    %9 = vector.load %arg0[%c0_10, %c0_11] : memref<16x24xbf16, #tpu.memory_space<vmem>>, vector<16x24xbf16>
    %cst = arith.constant dense<0.000000e+00> : vector<16x192xf32>
    %10 = tpu.matmul %9, %0, %cst {dimension_numbers = #tpu.dot_dimension_numbers<[1], [0], [0], [1], [0, 0, 1, 1], [], []>} : vector<16x24xbf16>, vector<24x192xbf16>, vector<16x192xf32> -> vector<16x192xf32>
    %11 = vector.broadcast %5 : vector<1x192xf32> to vector<16x192xf32>
    %12 = arith.addf %10, %11 : vector<16x192xf32>
    %cst_12 = arith.constant 0.000000e+00 : f32
    %13 = vector.broadcast %cst_12 : f32 to vector<2x64xf32>
    %14 = vector.extract_strided_slice %12 {offsets = [0, 0], sizes = [2, 192], strides = [1, 1]} : vector<16x192xf32> to vector<2x192xf32>
    %15 = arith.truncf %13 : vector<2x64xf32> to vector<2x64xbf16>
    %cst_13 = arith.constant dense<0.000000e+00> : vector<2x192xf32>
    %16 = tpu.matmul %15, %1, %cst_13 {dimension_numbers = #tpu.dot_dimension_numbers<[1], [0], [0], [1], [0, 0, 1, 1], [], []>} : vector<2x64xbf16>, vector<64x192xbf16>, vector<2x192xf32> -> vector<2x192xf32>
    %17 = vector.broadcast %6 : vector<1x192xf32> to vector<2x192xf32>
    %18 = arith.addf %16, %17 : vector<2x192xf32>
    %19 = vector.extract_strided_slice %14 {offsets = [0, 0], sizes = [2, 128], strides = [1, 1]} : vector<2x192xf32> to vector<2x128xf32>
    %20 = vector.extract_strided_slice %18 {offsets = [0, 0], sizes = [2, 128], strides = [1, 1]} : vector<2x192xf32> to vector<2x128xf32>
    %21 = arith.addf %19, %20 : vector<2x128xf32>
    %22 = arith.negf %21 : vector<2x128xf32>
    %23 = math.exp %22 : vector<2x128xf32>
    %cst_14 = arith.constant 1.000000e+00 : f32
    %24 = vector.broadcast %cst_14 : f32 to vector<2x128xf32>
    %25 = arith.addf %24, %23 : vector<2x128xf32>
    %26 = arith.divf %24, %25 : vector<2x128xf32>
    %27 = vector.extract_strided_slice %26 {offsets = [0, 0], sizes = [2, 64], strides = [1, 1]} : vector<2x128xf32> to vector<2x64xf32>
    %28 = vector.extract_strided_slice %26 {offsets = [0, 64], sizes = [2, 64], strides = [1, 1]} : vector<2x128xf32> to vector<2x64xf32>
    %29 = vector.extract_strided_slice %14 {offsets = [0, 128], sizes = [2, 64], strides = [1, 1]} : vector<2x192xf32> to vector<2x64xf32>
    %30 = vector.extract_strided_slice %18 {offsets = [0, 128], sizes = [2, 64], strides = [1, 1]} : vector<2x192xf32> to vector<2x64xf32>
    %31 = arith.mulf %27, %30 : vector<2x64xf32>
    %32 = arith.addf %29, %31 : vector<2x64xf32>
    %33 = math.tanh %32 : vector<2x64xf32>
    %cst_15 = arith.constant 1.000000e+00 : f32
    %34 = vector.broadcast %cst_15 : f32 to vector<2x64xf32>
    %35 = arith.subf %34, %28 : vector<2x64xf32>
    %36 = arith.mulf %35, %33 : vector<2x64xf32>
    %37 = arith.mulf %28, %13 : vector<2x64xf32>
    %38 = arith.addf %36, %37 : vector<2x64xf32>
    %c0_16 = arith.constant 0 : index
    %c0_17 = arith.constant 0 : index
    %39 = vector.load %arg4[%c0_16, %c0_17] : memref<16x64xf32, #tpu.memory_space<vmem>>, vector<2x64xf32>
    tpu.vector_store %arg4[%c0_16, %c0_17], %38 {strides = array<i32>} : memref<16x64xf32, #tpu.memory_space<vmem>>, vector<2x64xf32>,
    %c14 = arith.constant 14 : index
    %c0_18 = arith.constant 0 : index
    %40 = vector.load %arg5[%c14, %c0_18] : memref<16x64xf32, #tpu.memory_space<vmem>>, vector<2x64xf32>
    tpu.vector_store %arg5[%c14, %c0_18], %38 {strides = array<i32>} : memref<16x64xf32, #tpu.memory_space<vmem>>, vector<2x64xf32>,
    %41 = vector.extract_strided_slice %12 {offsets = [2, 0], sizes = [2, 192], strides = [1, 1]} : vector<16x192xf32> to vector<2x192xf32>
    %42 = arith.truncf %38 : vector<2x64xf32> to vector<2x64xbf16>
    %cst_19 = arith.constant dense<0.000000e+00> : vector<2x192xf32>
    %43 = tpu.matmul %42, %1, %cst_19 {dimension_numbers = #tpu.dot_dimension_numbers<[1], [0], [0], [1], [0, 0, 1, 1], [], []>} : vector<2x64xbf16>, vector<64x192xbf16>, vector<2x192xf32> -> vector<2x192xf32>
    %44 = vector.broadcast %6 : vector<1x192xf32> to vector<2x192xf32>
    %45 = arith.addf %43, %44 : vector<2x192xf32>
    %46 = vector.extract_strided_slice %41 {offsets = [0, 0], sizes = [2, 128], strides = [1, 1]} : vector<2x192xf32> to vector<2x128xf32>
    %47 = vector.extract_strided_slice %45 {offsets = [0, 0], sizes = [2, 128], strides = [1, 1]} : vector<2x192xf32> to vector<2x128xf32>
    %48 = arith.addf %46, %47 : vector<2x128xf32>
    %49 = arith.negf %48 : vector<2x128xf32>
    %50 = math.exp %49 : vector<2x128xf32>
    %cst_20 = arith.constant 1.000000e+00 : f32
    %51 = vector.broadcast %cst_20 : f32 to vector<2x128xf32>
    %52 = arith.addf %51, %50 : vector<2x128xf32>
    %53 = arith.divf %51, %52 : vector<2x128xf32>
    %54 = vector.extract_strided_slice %53 {offsets = [0, 0], sizes = [2, 64], strides = [1, 1]} : vector<2x128xf32> to vector<2x64xf32>
    %55 = vector.extract_strided_slice %53 {offsets = [0, 64], sizes = [2, 64], strides = [1, 1]} : vector<2x128xf32> to vector<2x64xf32>
    %56 = vector.extract_strided_slice %41 {offsets = [0, 128], sizes = [2, 64], strides = [1, 1]} : vector<2x192xf32> to vector<2x64xf32>
    %57 = vector.extract_strided_slice %45 {offsets = [0, 128], sizes = [2, 64], strides = [1, 1]} : vector<2x192xf32> to vector<2x64xf32>
    %58 = arith.mulf %54, %57 : vector<2x64xf32>
    %59 = arith.addf %56, %58 : vector<2x64xf32>
    %60 = math.tanh %59 : vector<2x64xf32>
    %cst_21 = arith.constant 1.000000e+00 : f32
    %61 = vector.broadcast %cst_21 : f32 to vector<2x64xf32>
    %62 = arith.subf %61, %55 : vector<2x64xf32>
    %63 = arith.mulf %62, %60 : vector<2x64xf32>
    %64 = arith.mulf %55, %38 : vector<2x64xf32>
    %65 = arith.addf %63, %64 : vector<2x64xf32>
    %c2_22 = arith.constant 2 : index
    %c0_23 = arith.constant 0 : index
    %66 = vector.load %arg4[%c2_22, %c0_23] : memref<16x64xf32, #tpu.memory_space<vmem>>, vector<2x64xf32>
    tpu.vector_store %arg4[%c2_22, %c0_23], %65 {strides = array<i32>} : memref<16x64xf32, #tpu.memory_space<vmem>>, vector<2x64xf32>,
    %c12 = arith.constant 12 : index
    %c0_24 = arith.constant 0 : index
    %67 = vector.load %arg5[%c12, %c0_24] : memref<16x64xf32, #tpu.memory_space<vmem>>, vector<2x64xf32>
    tpu.vector_store %arg5[%c12, %c0_24], %65 {strides = array<i32>} : memref<16x64xf32, #tpu.memory_space<vmem>>, vector<2x64xf32>,
    %68 = vector.extract_strided_slice %12 {offsets = [4, 0], sizes = [2, 192], strides = [1, 1]} : vector<16x192xf32> to vector<2x192xf32>
    %69 = arith.truncf %65 : vector<2x64xf32> to vector<2x64xbf16>
    %cst_25 = arith.constant dense<0.000000e+00> : vector<2x192xf32>
    %70 = tpu.matmul %69, %1, %cst_25 {dimension_numbers = #tpu.dot_dimension_numbers<[1], [0], [0], [1], [0, 0, 1, 1], [], []>} : vector<2x64xbf16>, vector<64x192xbf16>, vector<2x192xf32> -> vector<2x192xf32>
    %71 = vector.broadcast %6 : vector<1x192xf32> to vector<2x192xf32>
    %72 = arith.addf %70, %71 : vector<2x192xf32>
    %73 = vector.extract_strided_slice %68 {offsets = [0, 0], sizes = [2, 128], strides = [1, 1]} : vector<2x192xf32> to vector<2x128xf32>
    %74 = vector.extract_strided_slice %72 {offsets = [0, 0], sizes = [2, 128], strides = [1, 1]} : vector<2x192xf32> to vector<2x128xf32>
    %75 = arith.addf %73, %74 : vector<2x128xf32>
    %76 = arith.negf %75 : vector<2x128xf32>
    %77 = math.exp %76 : vector<2x128xf32>
    %cst_26 = arith.constant 1.000000e+00 : f32
    %78 = vector.broadcast %cst_26 : f32 to vector<2x128xf32>
    %79 = arith.addf %78, %77 : vector<2x128xf32>
    %80 = arith.divf %78, %79 : vector<2x128xf32>
    %81 = vector.extract_strided_slice %80 {offsets = [0, 0], sizes = [2, 64], strides = [1, 1]} : vector<2x128xf32> to vector<2x64xf32>
    %82 = vector.extract_strided_slice %80 {offsets = [0, 64], sizes = [2, 64], strides = [1, 1]} : vector<2x128xf32> to vector<2x64xf32>
    %83 = vector.extract_strided_slice %68 {offsets = [0, 128], sizes = [2, 64], strides = [1, 1]} : vector<2x192xf32> to vector<2x64xf32>
    %84 = vector.extract_strided_slice %72 {offsets = [0, 128], sizes = [2, 64], strides = [1, 1]} : vector<2x192xf32> to vector<2x64xf32>
    %85 = arith.mulf %81, %84 : vector<2x64xf32>
    %86 = arith.addf %83, %85 : vector<2x64xf32>
    %87 = math.tanh %86 : vector<2x64xf32>
    %cst_27 = arith.constant 1.000000e+00 : f32
    %88 = vector.broadcast %cst_27 : f32 to vector<2x64xf32>
    %89 = arith.subf %88, %82 : vector<2x64xf32>
    %90 = arith.mulf %89, %87 : vector<2x64xf32>
    %91 = arith.mulf %82, %65 : vector<2x64xf32>
    %92 = arith.addf %90, %91 : vector<2x64xf32>
    %c4 = arith.constant 4 : index
    %c0_28 = arith.constant 0 : index
    %93 = vector.load %arg4[%c4, %c0_28] : memref<16x64xf32, #tpu.memory_space<vmem>>, vector<2x64xf32>
    tpu.vector_store %arg4[%c4, %c0_28], %92 {strides = array<i32>} : memref<16x64xf32, #tpu.memory_space<vmem>>, vector<2x64xf32>,
    %c10 = arith.constant 10 : index
    %c0_29 = arith.constant 0 : index
    %94 = vector.load %arg5[%c10, %c0_29] : memref<16x64xf32, #tpu.memory_space<vmem>>, vector<2x64xf32>
    tpu.vector_store %arg5[%c10, %c0_29], %92 {strides = array<i32>} : memref<16x64xf32, #tpu.memory_space<vmem>>, vector<2x64xf32>,
    %95 = vector.extract_strided_slice %12 {offsets = [6, 0], sizes = [2, 192], strides = [1, 1]} : vector<16x192xf32> to vector<2x192xf32>
    %96 = arith.truncf %92 : vector<2x64xf32> to vector<2x64xbf16>
    %cst_30 = arith.constant dense<0.000000e+00> : vector<2x192xf32>
    %97 = tpu.matmul %96, %1, %cst_30 {dimension_numbers = #tpu.dot_dimension_numbers<[1], [0], [0], [1], [0, 0, 1, 1], [], []>} : vector<2x64xbf16>, vector<64x192xbf16>, vector<2x192xf32> -> vector<2x192xf32>
    %98 = vector.broadcast %6 : vector<1x192xf32> to vector<2x192xf32>
    %99 = arith.addf %97, %98 : vector<2x192xf32>
    %100 = vector.extract_strided_slice %95 {offsets = [0, 0], sizes = [2, 128], strides = [1, 1]} : vector<2x192xf32> to vector<2x128xf32>
    %101 = vector.extract_strided_slice %99 {offsets = [0, 0], sizes = [2, 128], strides = [1, 1]} : vector<2x192xf32> to vector<2x128xf32>
    %102 = arith.addf %100, %101 : vector<2x128xf32>
    %103 = arith.negf %102 : vector<2x128xf32>
    %104 = math.exp %103 : vector<2x128xf32>
    %cst_31 = arith.constant 1.000000e+00 : f32
    %105 = vector.broadcast %cst_31 : f32 to vector<2x128xf32>
    %106 = arith.addf %105, %104 : vector<2x128xf32>
    %107 = arith.divf %105, %106 : vector<2x128xf32>
    %108 = vector.extract_strided_slice %107 {offsets = [0, 0], sizes = [2, 64], strides = [1, 1]} : vector<2x128xf32> to vector<2x64xf32>
    %109 = vector.extract_strided_slice %107 {offsets = [0, 64], sizes = [2, 64], strides = [1, 1]} : vector<2x128xf32> to vector<2x64xf32>
    %110 = vector.extract_strided_slice %95 {offsets = [0, 128], sizes = [2, 64], strides = [1, 1]} : vector<2x192xf32> to vector<2x64xf32>
    %111 = vector.extract_strided_slice %99 {offsets = [0, 128], sizes = [2, 64], strides = [1, 1]} : vector<2x192xf32> to vector<2x64xf32>
    %112 = arith.mulf %108, %111 : vector<2x64xf32>
    %113 = arith.addf %110, %112 : vector<2x64xf32>
    %114 = math.tanh %113 : vector<2x64xf32>
    %cst_32 = arith.constant 1.000000e+00 : f32
    %115 = vector.broadcast %cst_32 : f32 to vector<2x64xf32>
    %116 = arith.subf %115, %109 : vector<2x64xf32>
    %117 = arith.mulf %116, %114 : vector<2x64xf32>
    %118 = arith.mulf %109, %92 : vector<2x64xf32>
    %119 = arith.addf %117, %118 : vector<2x64xf32>
    %c6 = arith.constant 6 : index
    %c0_33 = arith.constant 0 : index
    %120 = vector.load %arg4[%c6, %c0_33] : memref<16x64xf32, #tpu.memory_space<vmem>>, vector<2x64xf32>
    tpu.vector_store %arg4[%c6, %c0_33], %119 {strides = array<i32>} : memref<16x64xf32, #tpu.memory_space<vmem>>, vector<2x64xf32>,
    %c8 = arith.constant 8 : index
    %c0_34 = arith.constant 0 : index
    %121 = vector.load %arg5[%c8, %c0_34] : memref<16x64xf32, #tpu.memory_space<vmem>>, vector<2x64xf32>
    tpu.vector_store %arg5[%c8, %c0_34], %119 {strides = array<i32>} : memref<16x64xf32, #tpu.memory_space<vmem>>, vector<2x64xf32>,
    %122 = vector.extract_strided_slice %12 {offsets = [8, 0], sizes = [2, 192], strides = [1, 1]} : vector<16x192xf32> to vector<2x192xf32>
    %123 = arith.truncf %119 : vector<2x64xf32> to vector<2x64xbf16>
    %cst_35 = arith.constant dense<0.000000e+00> : vector<2x192xf32>
    %124 = tpu.matmul %123, %1, %cst_35 {dimension_numbers = #tpu.dot_dimension_numbers<[1], [0], [0], [1], [0, 0, 1, 1], [], []>} : vector<2x64xbf16>, vector<64x192xbf16>, vector<2x192xf32> -> vector<2x192xf32>
    %125 = vector.broadcast %6 : vector<1x192xf32> to vector<2x192xf32>
    %126 = arith.addf %124, %125 : vector<2x192xf32>
    %127 = vector.extract_strided_slice %122 {offsets = [0, 0], sizes = [2, 128], strides = [1, 1]} : vector<2x192xf32> to vector<2x128xf32>
    %128 = vector.extract_strided_slice %126 {offsets = [0, 0], sizes = [2, 128], strides = [1, 1]} : vector<2x192xf32> to vector<2x128xf32>
    %129 = arith.addf %127, %128 : vector<2x128xf32>
    %130 = arith.negf %129 : vector<2x128xf32>
    %131 = math.exp %130 : vector<2x128xf32>
    %cst_36 = arith.constant 1.000000e+00 : f32
    %132 = vector.broadcast %cst_36 : f32 to vector<2x128xf32>
    %133 = arith.addf %132, %131 : vector<2x128xf32>
    %134 = arith.divf %132, %133 : vector<2x128xf32>
    %135 = vector.extract_strided_slice %134 {offsets = [0, 0], sizes = [2, 64], strides = [1, 1]} : vector<2x128xf32> to vector<2x64xf32>
    %136 = vector.extract_strided_slice %134 {offsets = [0, 64], sizes = [2, 64], strides = [1, 1]} : vector<2x128xf32> to vector<2x64xf32>
    %137 = vector.extract_strided_slice %122 {offsets = [0, 128], sizes = [2, 64], strides = [1, 1]} : vector<2x192xf32> to vector<2x64xf32>
    %138 = vector.extract_strided_slice %126 {offsets = [0, 128], sizes = [2, 64], strides = [1, 1]} : vector<2x192xf32> to vector<2x64xf32>
    %139 = arith.mulf %135, %138 : vector<2x64xf32>
    %140 = arith.addf %137, %139 : vector<2x64xf32>
    %141 = math.tanh %140 : vector<2x64xf32>
    %cst_37 = arith.constant 1.000000e+00 : f32
    %142 = vector.broadcast %cst_37 : f32 to vector<2x64xf32>
    %143 = arith.subf %142, %136 : vector<2x64xf32>
    %144 = arith.mulf %143, %141 : vector<2x64xf32>
    %145 = arith.mulf %136, %119 : vector<2x64xf32>
    %146 = arith.addf %144, %145 : vector<2x64xf32>
    %c8_38 = arith.constant 8 : index
    %c0_39 = arith.constant 0 : index
    %147 = vector.load %arg4[%c8_38, %c0_39] : memref<16x64xf32, #tpu.memory_space<vmem>>, vector<2x64xf32>
    tpu.vector_store %arg4[%c8_38, %c0_39], %146 {strides = array<i32>} : memref<16x64xf32, #tpu.memory_space<vmem>>, vector<2x64xf32>,
    %c6_40 = arith.constant 6 : index
    %c0_41 = arith.constant 0 : index
    %148 = vector.load %arg5[%c6_40, %c0_41] : memref<16x64xf32, #tpu.memory_space<vmem>>, vector<2x64xf32>
    tpu.vector_store %arg5[%c6_40, %c0_41], %146 {strides = array<i32>} : memref<16x64xf32, #tpu.memory_space<vmem>>, vector<2x64xf32>,
    %149 = vector.extract_strided_slice %12 {offsets = [10, 0], sizes = [2, 192], strides = [1, 1]} : vector<16x192xf32> to vector<2x192xf32>
    %150 = arith.truncf %146 : vector<2x64xf32> to vector<2x64xbf16>
    %cst_42 = arith.constant dense<0.000000e+00> : vector<2x192xf32>
    %151 = tpu.matmul %150, %1, %cst_42 {dimension_numbers = #tpu.dot_dimension_numbers<[1], [0], [0], [1], [0, 0, 1, 1], [], []>} : vector<2x64xbf16>, vector<64x192xbf16>, vector<2x192xf32> -> vector<2x192xf32>
    %152 = vector.broadcast %6 : vector<1x192xf32> to vector<2x192xf32>
    %153 = arith.addf %151, %152 : vector<2x192xf32>
    %154 = vector.extract_strided_slice %149 {offsets = [0, 0], sizes = [2, 128], strides = [1, 1]} : vector<2x192xf32> to vector<2x128xf32>
    %155 = vector.extract_strided_slice %153 {offsets = [0, 0], sizes = [2, 128], strides = [1, 1]} : vector<2x192xf32> to vector<2x128xf32>
    %156 = arith.addf %154, %155 : vector<2x128xf32>
    %157 = arith.negf %156 : vector<2x128xf32>
    %158 = math.exp %157 : vector<2x128xf32>
    %cst_43 = arith.constant 1.000000e+00 : f32
    %159 = vector.broadcast %cst_43 : f32 to vector<2x128xf32>
    %160 = arith.addf %159, %158 : vector<2x128xf32>
    %161 = arith.divf %159, %160 : vector<2x128xf32>
    %162 = vector.extract_strided_slice %161 {offsets = [0, 0], sizes = [2, 64], strides = [1, 1]} : vector<2x128xf32> to vector<2x64xf32>
    %163 = vector.extract_strided_slice %161 {offsets = [0, 64], sizes = [2, 64], strides = [1, 1]} : vector<2x128xf32> to vector<2x64xf32>
    %164 = vector.extract_strided_slice %149 {offsets = [0, 128], sizes = [2, 64], strides = [1, 1]} : vector<2x192xf32> to vector<2x64xf32>
    %165 = vector.extract_strided_slice %153 {offsets = [0, 128], sizes = [2, 64], strides = [1, 1]} : vector<2x192xf32> to vector<2x64xf32>
    %166 = arith.mulf %162, %165 : vector<2x64xf32>
    %167 = arith.addf %164, %166 : vector<2x64xf32>
    %168 = math.tanh %167 : vector<2x64xf32>
    %cst_44 = arith.constant 1.000000e+00 : f32
    %169 = vector.broadcast %cst_44 : f32 to vector<2x64xf32>
    %170 = arith.subf %169, %163 : vector<2x64xf32>
    %171 = arith.mulf %170, %168 : vector<2x64xf32>
    %172 = arith.mulf %163, %146 : vector<2x64xf32>
    %173 = arith.addf %171, %172 : vector<2x64xf32>
    %c10_45 = arith.constant 10 : index
    %c0_46 = arith.constant 0 : index
    %174 = vector.load %arg4[%c10_45, %c0_46] : memref<16x64xf32, #tpu.memory_space<vmem>>, vector<2x64xf32>
    tpu.vector_store %arg4[%c10_45, %c0_46], %173 {strides = array<i32>} : memref<16x64xf32, #tpu.memory_space<vmem>>, vector<2x64xf32>,
    %c4_47 = arith.constant 4 : index
    %c0_48 = arith.constant 0 : index
    %175 = vector.load %arg5[%c4_47, %c0_48] : memref<16x64xf32, #tpu.memory_space<vmem>>, vector<2x64xf32>
    tpu.vector_store %arg5[%c4_47, %c0_48], %173 {strides = array<i32>} : memref<16x64xf32, #tpu.memory_space<vmem>>, vector<2x64xf32>,
    %176 = vector.extract_strided_slice %12 {offsets = [12, 0], sizes = [2, 192], strides = [1, 1]} : vector<16x192xf32> to vector<2x192xf32>
    %177 = arith.truncf %173 : vector<2x64xf32> to vector<2x64xbf16>
    %cst_49 = arith.constant dense<0.000000e+00> : vector<2x192xf32>
    %178 = tpu.matmul %177, %1, %cst_49 {dimension_numbers = #tpu.dot_dimension_numbers<[1], [0], [0], [1], [0, 0, 1, 1], [], []>} : vector<2x64xbf16>, vector<64x192xbf16>, vector<2x192xf32> -> vector<2x192xf32>
    %179 = vector.broadcast %6 : vector<1x192xf32> to vector<2x192xf32>
    %180 = arith.addf %178, %179 : vector<2x192xf32>
    %181 = vector.extract_strided_slice %176 {offsets = [0, 0], sizes = [2, 128], strides = [1, 1]} : vector<2x192xf32> to vector<2x128xf32>
    %182 = vector.extract_strided_slice %180 {offsets = [0, 0], sizes = [2, 128], strides = [1, 1]} : vector<2x192xf32> to vector<2x128xf32>
    %183 = arith.addf %181, %182 : vector<2x128xf32>
    %184 = arith.negf %183 : vector<2x128xf32>
    %185 = math.exp %184 : vector<2x128xf32>
    %cst_50 = arith.constant 1.000000e+00 : f32
    %186 = vector.broadcast %cst_50 : f32 to vector<2x128xf32>
    %187 = arith.addf %186, %185 : vector<2x128xf32>
    %188 = arith.divf %186, %187 : vector<2x128xf32>
    %189 = vector.extract_strided_slice %188 {offsets = [0, 0], sizes = [2, 64], strides = [1, 1]} : vector<2x128xf32> to vector<2x64xf32>
    %190 = vector.extract_strided_slice %188 {offsets = [0, 64], sizes = [2, 64], strides = [1, 1]} : vector<2x128xf32> to vector<2x64xf32>
    %191 = vector.extract_strided_slice %176 {offsets = [0, 128], sizes = [2, 64], strides = [1, 1]} : vector<2x192xf32> to vector<2x64xf32>
    %192 = vector.extract_strided_slice %180 {offsets = [0, 128], sizes = [2, 64], strides = [1, 1]} : vector<2x192xf32> to vector<2x64xf32>
    %193 = arith.mulf %189, %192 : vector<2x64xf32>
    %194 = arith.addf %191, %193 : vector<2x64xf32>
    %195 = math.tanh %194 : vector<2x64xf32>
    %cst_51 = arith.constant 1.000000e+00 : f32
    %196 = vector.broadcast %cst_51 : f32 to vector<2x64xf32>
    %197 = arith.subf %196, %190 : vector<2x64xf32>
    %198 = arith.mulf %197, %195 : vector<2x64xf32>
    %199 = arith.mulf %190, %173 : vector<2x64xf32>
    %200 = arith.addf %198, %199 : vector<2x64xf32>
    %c12_52 = arith.constant 12 : index
    %c0_53 = arith.constant 0 : index
    %201 = vector.load %arg4[%c12_52, %c0_53] : memref<16x64xf32, #tpu.memory_space<vmem>>, vector<2x64xf32>
    tpu.vector_store %arg4[%c12_52, %c0_53], %200 {strides = array<i32>} : memref<16x64xf32, #tpu.memory_space<vmem>>, vector<2x64xf32>,
    %c2_54 = arith.constant 2 : index
    %c0_55 = arith.constant 0 : index
    %202 = vector.load %arg5[%c2_54, %c0_55] : memref<16x64xf32, #tpu.memory_space<vmem>>, vector<2x64xf32>
    tpu.vector_store %arg5[%c2_54, %c0_55], %200 {strides = array<i32>} : memref<16x64xf32, #tpu.memory_space<vmem>>, vector<2x64xf32>,
    %203 = vector.extract_strided_slice %12 {offsets = [14, 0], sizes = [2, 192], strides = [1, 1]} : vector<16x192xf32> to vector<2x192xf32>
    %204 = arith.truncf %200 : vector<2x64xf32> to vector<2x64xbf16>
    %cst_56 = arith.constant dense<0.000000e+00> : vector<2x192xf32>
    %205 = tpu.matmul %204, %1, %cst_56 {dimension_numbers = #tpu.dot_dimension_numbers<[1], [0], [0], [1], [0, 0, 1, 1], [], []>} : vector<2x64xbf16>, vector<64x192xbf16>, vector<2x192xf32> -> vector<2x192xf32>
    %206 = vector.broadcast %6 : vector<1x192xf32> to vector<2x192xf32>
    %207 = arith.addf %205, %206 : vector<2x192xf32>
    %208 = vector.extract_strided_slice %203 {offsets = [0, 0], sizes = [2, 128], strides = [1, 1]} : vector<2x192xf32> to vector<2x128xf32>
    %209 = vector.extract_strided_slice %207 {offsets = [0, 0], sizes = [2, 128], strides = [1, 1]} : vector<2x192xf32> to vector<2x128xf32>
    %210 = arith.addf %208, %209 : vector<2x128xf32>
    %211 = arith.negf %210 : vector<2x128xf32>
    %212 = math.exp %211 : vector<2x128xf32>
    %cst_57 = arith.constant 1.000000e+00 : f32
    %213 = vector.broadcast %cst_57 : f32 to vector<2x128xf32>
    %214 = arith.addf %213, %212 : vector<2x128xf32>
    %215 = arith.divf %213, %214 : vector<2x128xf32>
    %216 = vector.extract_strided_slice %215 {offsets = [0, 0], sizes = [2, 64], strides = [1, 1]} : vector<2x128xf32> to vector<2x64xf32>
    %217 = vector.extract_strided_slice %215 {offsets = [0, 64], sizes = [2, 64], strides = [1, 1]} : vector<2x128xf32> to vector<2x64xf32>
    %218 = vector.extract_strided_slice %203 {offsets = [0, 128], sizes = [2, 64], strides = [1, 1]} : vector<2x192xf32> to vector<2x64xf32>
    %219 = vector.extract_strided_slice %207 {offsets = [0, 128], sizes = [2, 64], strides = [1, 1]} : vector<2x192xf32> to vector<2x64xf32>
    %220 = arith.mulf %216, %219 : vector<2x64xf32>
    %221 = arith.addf %218, %220 : vector<2x64xf32>
    %222 = math.tanh %221 : vector<2x64xf32>
    %cst_58 = arith.constant 1.000000e+00 : f32
    %223 = vector.broadcast %cst_58 : f32 to vector<2x64xf32>
    %224 = arith.subf %223, %217 : vector<2x64xf32>
    %225 = arith.mulf %224, %222 : vector<2x64xf32>
    %226 = arith.mulf %217, %200 : vector<2x64xf32>
    %227 = arith.addf %225, %226 : vector<2x64xf32>
    %c14_59 = arith.constant 14 : index
    %c0_60 = arith.constant 0 : index
    %228 = vector.load %arg4[%c14_59, %c0_60] : memref<16x64xf32, #tpu.memory_space<vmem>>, vector<2x64xf32>
    tpu.vector_store %arg4[%c14_59, %c0_60], %227 {strides = array<i32>} : memref<16x64xf32, #tpu.memory_space<vmem>>, vector<2x64xf32>,
    %c0_61 = arith.constant 0 : index
    %c0_62 = arith.constant 0 : index
    %229 = vector.load %arg5[%c0_61, %c0_62] : memref<16x64xf32, #tpu.memory_space<vmem>>, vector<2x64xf32>
    tpu.vector_store %arg5[%c0_61, %c0_62], %227 {strides = array<i32>} : memref<16x64xf32, #tpu.memory_space<vmem>>, vector<2x64xf32>,
    %c0_63 = arith.constant 0 : index
    %c0_64 = arith.constant 0 : index
    %230 = vector.load %arg4[%c0_63, %c0_64] : memref<16x64xf32, #tpu.memory_space<vmem>>, vector<16x64xf32>
    %231 = arith.truncf %230 : vector<16x64xf32> to vector<16x64xbf16>
    %cst_65 = arith.constant dense<0.000000e+00> : vector<16x96xf32>
    %232 = tpu.matmul %231, %2, %cst_65 {dimension_numbers = #tpu.dot_dimension_numbers<[1], [0], [0], [1], [0, 0, 1, 1], [], []>} : vector<16x64xbf16>, vector<64x96xbf16>, vector<16x96xf32> -> vector<16x96xf32>
    %c0_66 = arith.constant 0 : index
    %c0_67 = arith.constant 0 : index
    %233 = vector.load %arg5[%c0_66, %c0_67] : memref<16x64xf32, #tpu.memory_space<vmem>>, vector<16x64xf32>
    %234 = arith.truncf %233 : vector<16x64xf32> to vector<16x64xbf16>
    %cst_68 = arith.constant dense<0.000000e+00> : vector<16x96xf32>
    %235 = tpu.matmul %234, %3, %cst_68 {dimension_numbers = #tpu.dot_dimension_numbers<[1], [0], [0], [1], [0, 0, 1, 1], [], []>} : vector<16x64xbf16>, vector<64x96xbf16>, vector<16x96xf32> -> vector<16x96xf32>
    %236 = arith.addf %232, %235 : vector<16x96xf32>
    %237 = vector.broadcast %7 : vector<1x96xf32> to vector<16x96xf32>
    %238 = arith.addf %236, %237 : vector<16x96xf32>
    %cst_69 = arith.constant 0.000000e+00 : f32
    %239 = vector.broadcast %cst_69 : f32 to vector<2x32xf32>
    %240 = vector.extract_strided_slice %238 {offsets = [0, 0], sizes = [2, 96], strides = [1, 1]} : vector<16x96xf32> to vector<2x96xf32>
    %241 = arith.truncf %239 : vector<2x32xf32> to vector<2x32xbf16>
    %cst_70 = arith.constant dense<0.000000e+00> : vector<2x96xf32>
    %242 = tpu.matmul %241, %4, %cst_70 {dimension_numbers = #tpu.dot_dimension_numbers<[1], [0], [0], [1], [0, 0, 1, 1], [], []>} : vector<2x32xbf16>, vector<32x96xbf16>, vector<2x96xf32> -> vector<2x96xf32>
    %243 = vector.broadcast %8 : vector<1x96xf32> to vector<2x96xf32>
    %244 = arith.addf %242, %243 : vector<2x96xf32>
    %245 = vector.extract_strided_slice %240 {offsets = [0, 0], sizes = [2, 64], strides = [1, 1]} : vector<2x96xf32> to vector<2x64xf32>
    %246 = vector.extract_strided_slice %244 {offsets = [0, 0], sizes = [2, 64], strides = [1, 1]} : vector<2x96xf32> to vector<2x64xf32>
    %247 = arith.addf %245, %246 : vector<2x64xf32>
    %248 = arith.negf %247 : vector<2x64xf32>
    %249 = math.exp %248 : vector<2x64xf32>
    %cst_71 = arith.constant 1.000000e+00 : f32
    %250 = vector.broadcast %cst_71 : f32 to vector<2x64xf32>
    %251 = arith.addf %250, %249 : vector<2x64xf32>
    %252 = arith.divf %250, %251 : vector<2x64xf32>
    %253 = vector.extract_strided_slice %252 {offsets = [0, 0], sizes = [2, 32], strides = [1, 1]} : vector<2x64xf32> to vector<2x32xf32>
    %254 = vector.extract_strided_slice %252 {offsets = [0, 32], sizes = [2, 32], strides = [1, 1]} : vector<2x64xf32> to vector<2x32xf32>
    %255 = vector.extract_strided_slice %240 {offsets = [0, 64], sizes = [2, 32], strides = [1, 1]} : vector<2x96xf32> to vector<2x32xf32>
    %256 = vector.extract_strided_slice %244 {offsets = [0, 64], sizes = [2, 32], strides = [1, 1]} : vector<2x96xf32> to vector<2x32xf32>
    %257 = arith.mulf %253, %256 : vector<2x32xf32>
    %258 = arith.addf %255, %257 : vector<2x32xf32>
    %259 = math.tanh %258 : vector<2x32xf32>
    %cst_72 = arith.constant 1.000000e+00 : f32
    %260 = vector.broadcast %cst_72 : f32 to vector<2x32xf32>
    %261 = arith.subf %260, %254 : vector<2x32xf32>
    %262 = arith.mulf %261, %259 : vector<2x32xf32>
    %263 = arith.mulf %254, %239 : vector<2x32xf32>
    %264 = arith.addf %262, %263 : vector<2x32xf32>
    %265 = vector.extract_strided_slice %238 {offsets = [2, 0], sizes = [2, 96], strides = [1, 1]} : vector<16x96xf32> to vector<2x96xf32>
    %266 = arith.truncf %264 : vector<2x32xf32> to vector<2x32xbf16>
    %cst_73 = arith.constant dense<0.000000e+00> : vector<2x96xf32>
    %267 = tpu.matmul %266, %4, %cst_73 {dimension_numbers = #tpu.dot_dimension_numbers<[1], [0], [0], [1], [0, 0, 1, 1], [], []>} : vector<2x32xbf16>, vector<32x96xbf16>, vector<2x96xf32> -> vector<2x96xf32>
    %268 = vector.broadcast %8 : vector<1x96xf32> to vector<2x96xf32>
    %269 = arith.addf %267, %268 : vector<2x96xf32>
    %270 = vector.extract_strided_slice %265 {offsets = [0, 0], sizes = [2, 64], strides = [1, 1]} : vector<2x96xf32> to vector<2x64xf32>
    %271 = vector.extract_strided_slice %269 {offsets = [0, 0], sizes = [2, 64], strides = [1, 1]} : vector<2x96xf32> to vector<2x64xf32>
    %272 = arith.addf %270, %271 : vector<2x64xf32>
    %273 = arith.negf %272 : vector<2x64xf32>
    %274 = math.exp %273 : vector<2x64xf32>
    %cst_74 = arith.constant 1.000000e+00 : f32
    %275 = vector.broadcast %cst_74 : f32 to vector<2x64xf32>
    %276 = arith.addf %275, %274 : vector<2x64xf32>
    %277 = arith.divf %275, %276 : vector<2x64xf32>
    %278 = vector.extract_strided_slice %277 {offsets = [0, 0], sizes = [2, 32], strides = [1, 1]} : vector<2x64xf32> to vector<2x32xf32>
    %279 = vector.extract_strided_slice %277 {offsets = [0, 32], sizes = [2, 32], strides = [1, 1]} : vector<2x64xf32> to vector<2x32xf32>
    %280 = vector.extract_strided_slice %265 {offsets = [0, 64], sizes = [2, 32], strides = [1, 1]} : vector<2x96xf32> to vector<2x32xf32>
    %281 = vector.extract_strided_slice %269 {offsets = [0, 64], sizes = [2, 32], strides = [1, 1]} : vector<2x96xf32> to vector<2x32xf32>
    %282 = arith.mulf %278, %281 : vector<2x32xf32>
    %283 = arith.addf %280, %282 : vector<2x32xf32>
    %284 = math.tanh %283 : vector<2x32xf32>
    %cst_75 = arith.constant 1.000000e+00 : f32
    %285 = vector.broadcast %cst_75 : f32 to vector<2x32xf32>
    %286 = arith.subf %285, %279 : vector<2x32xf32>
    %287 = arith.mulf %286, %284 : vector<2x32xf32>
    %288 = arith.mulf %279, %264 : vector<2x32xf32>
    %289 = arith.addf %287, %288 : vector<2x32xf32>
    %290 = vector.extract_strided_slice %238 {offsets = [4, 0], sizes = [2, 96], strides = [1, 1]} : vector<16x96xf32> to vector<2x96xf32>
    %291 = arith.truncf %289 : vector<2x32xf32> to vector<2x32xbf16>
    %cst_76 = arith.constant dense<0.000000e+00> : vector<2x96xf32>
    %292 = tpu.matmul %291, %4, %cst_76 {dimension_numbers = #tpu.dot_dimension_numbers<[1], [0], [0], [1], [0, 0, 1, 1], [], []>} : vector<2x32xbf16>, vector<32x96xbf16>, vector<2x96xf32> -> vector<2x96xf32>
    %293 = vector.broadcast %8 : vector<1x96xf32> to vector<2x96xf32>
    %294 = arith.addf %292, %293 : vector<2x96xf32>
    %295 = vector.extract_strided_slice %290 {offsets = [0, 0], sizes = [2, 64], strides = [1, 1]} : vector<2x96xf32> to vector<2x64xf32>
    %296 = vector.extract_strided_slice %294 {offsets = [0, 0], sizes = [2, 64], strides = [1, 1]} : vector<2x96xf32> to vector<2x64xf32>
    %297 = arith.addf %295, %296 : vector<2x64xf32>
    %298 = arith.negf %297 : vector<2x64xf32>
    %299 = math.exp %298 : vector<2x64xf32>
    %cst_77 = arith.constant 1.000000e+00 : f32
    %300 = vector.broadcast %cst_77 : f32 to vector<2x64xf32>
    %301 = arith.addf %300, %299 : vector<2x64xf32>
    %302 = arith.divf %300, %301 : vector<2x64xf32>
    %303 = vector.extract_strided_slice %302 {offsets = [0, 0], sizes = [2, 32], strides = [1, 1]} : vector<2x64xf32> to vector<2x32xf32>
    %304 = vector.extract_strided_slice %302 {offsets = [0, 32], sizes = [2, 32], strides = [1, 1]} : vector<2x64xf32> to vector<2x32xf32>
    %305 = vector.extract_strided_slice %290 {offsets = [0, 64], sizes = [2, 32], strides = [1, 1]} : vector<2x96xf32> to vector<2x32xf32>
    %306 = vector.extract_strided_slice %294 {offsets = [0, 64], sizes = [2, 32], strides = [1, 1]} : vector<2x96xf32> to vector<2x32xf32>
    %307 = arith.mulf %303, %306 : vector<2x32xf32>
    %308 = arith.addf %305, %307 : vector<2x32xf32>
    %309 = math.tanh %308 : vector<2x32xf32>
    %cst_78 = arith.constant 1.000000e+00 : f32
    %310 = vector.broadcast %cst_78 : f32 to vector<2x32xf32>
    %311 = arith.subf %310, %304 : vector<2x32xf32>
    %312 = arith.mulf %311, %309 : vector<2x32xf32>
    %313 = arith.mulf %304, %289 : vector<2x32xf32>
    %314 = arith.addf %312, %313 : vector<2x32xf32>
    %315 = vector.extract_strided_slice %238 {offsets = [6, 0], sizes = [2, 96], strides = [1, 1]} : vector<16x96xf32> to vector<2x96xf32>
    %316 = arith.truncf %314 : vector<2x32xf32> to vector<2x32xbf16>
    %cst_79 = arith.constant dense<0.000000e+00> : vector<2x96xf32>
    %317 = tpu.matmul %316, %4, %cst_79 {dimension_numbers = #tpu.dot_dimension_numbers<[1], [0], [0], [1], [0, 0, 1, 1], [], []>} : vector<2x32xbf16>, vector<32x96xbf16>, vector<2x96xf32> -> vector<2x96xf32>
    %318 = vector.broadcast %8 : vector<1x96xf32> to vector<2x96xf32>
    %319 = arith.addf %317, %318 : vector<2x96xf32>
    %320 = vector.extract_strided_slice %315 {offsets = [0, 0], sizes = [2, 64], strides = [1, 1]} : vector<2x96xf32> to vector<2x64xf32>
    %321 = vector.extract_strided_slice %319 {offsets = [0, 0], sizes = [2, 64], strides = [1, 1]} : vector<2x96xf32> to vector<2x64xf32>
    %322 = arith.addf %320, %321 : vector<2x64xf32>
    %323 = arith.negf %322 : vector<2x64xf32>
    %324 = math.exp %323 : vector<2x64xf32>
    %cst_80 = arith.constant 1.000000e+00 : f32
    %325 = vector.broadcast %cst_80 : f32 to vector<2x64xf32>
    %326 = arith.addf %325, %324 : vector<2x64xf32>
    %327 = arith.divf %325, %326 : vector<2x64xf32>
    %328 = vector.extract_strided_slice %327 {offsets = [0, 0], sizes = [2, 32], strides = [1, 1]} : vector<2x64xf32> to vector<2x32xf32>
    %329 = vector.extract_strided_slice %327 {offsets = [0, 32], sizes = [2, 32], strides = [1, 1]} : vector<2x64xf32> to vector<2x32xf32>
    %330 = vector.extract_strided_slice %315 {offsets = [0, 64], sizes = [2, 32], strides = [1, 1]} : vector<2x96xf32> to vector<2x32xf32>
    %331 = vector.extract_strided_slice %319 {offsets = [0, 64], sizes = [2, 32], strides = [1, 1]} : vector<2x96xf32> to vector<2x32xf32>
    %332 = arith.mulf %328, %331 : vector<2x32xf32>
    %333 = arith.addf %330, %332 : vector<2x32xf32>
    %334 = math.tanh %333 : vector<2x32xf32>
    %cst_81 = arith.constant 1.000000e+00 : f32
    %335 = vector.broadcast %cst_81 : f32 to vector<2x32xf32>
    %336 = arith.subf %335, %329 : vector<2x32xf32>
    %337 = arith.mulf %336, %334 : vector<2x32xf32>
    %338 = arith.mulf %329, %314 : vector<2x32xf32>
    %339 = arith.addf %337, %338 : vector<2x32xf32>
    %340 = vector.extract_strided_slice %238 {offsets = [8, 0], sizes = [2, 96], strides = [1, 1]} : vector<16x96xf32> to vector<2x96xf32>
    %341 = arith.truncf %339 : vector<2x32xf32> to vector<2x32xbf16>
    %cst_82 = arith.constant dense<0.000000e+00> : vector<2x96xf32>
    %342 = tpu.matmul %341, %4, %cst_82 {dimension_numbers = #tpu.dot_dimension_numbers<[1], [0], [0], [1], [0, 0, 1, 1], [], []>} : vector<2x32xbf16>, vector<32x96xbf16>, vector<2x96xf32> -> vector<2x96xf32>
    %343 = vector.broadcast %8 : vector<1x96xf32> to vector<2x96xf32>
    %344 = arith.addf %342, %343 : vector<2x96xf32>
    %345 = vector.extract_strided_slice %340 {offsets = [0, 0], sizes = [2, 64], strides = [1, 1]} : vector<2x96xf32> to vector<2x64xf32>
    %346 = vector.extract_strided_slice %344 {offsets = [0, 0], sizes = [2, 64], strides = [1, 1]} : vector<2x96xf32> to vector<2x64xf32>
    %347 = arith.addf %345, %346 : vector<2x64xf32>
    %348 = arith.negf %347 : vector<2x64xf32>
    %349 = math.exp %348 : vector<2x64xf32>
    %cst_83 = arith.constant 1.000000e+00 : f32
    %350 = vector.broadcast %cst_83 : f32 to vector<2x64xf32>
    %351 = arith.addf %350, %349 : vector<2x64xf32>
    %352 = arith.divf %350, %351 : vector<2x64xf32>
    %353 = vector.extract_strided_slice %352 {offsets = [0, 0], sizes = [2, 32], strides = [1, 1]} : vector<2x64xf32> to vector<2x32xf32>
    %354 = vector.extract_strided_slice %352 {offsets = [0, 32], sizes = [2, 32], strides = [1, 1]} : vector<2x64xf32> to vector<2x32xf32>
    %355 = vector.extract_strided_slice %340 {offsets = [0, 64], sizes = [2, 32], strides = [1, 1]} : vector<2x96xf32> to vector<2x32xf32>
    %356 = vector.extract_strided_slice %344 {offsets = [0, 64], sizes = [2, 32], strides = [1, 1]} : vector<2x96xf32> to vector<2x32xf32>
    %357 = arith.mulf %353, %356 : vector<2x32xf32>
    %358 = arith.addf %355, %357 : vector<2x32xf32>
    %359 = math.tanh %358 : vector<2x32xf32>
    %cst_84 = arith.constant 1.000000e+00 : f32
    %360 = vector.broadcast %cst_84 : f32 to vector<2x32xf32>
    %361 = arith.subf %360, %354 : vector<2x32xf32>
    %362 = arith.mulf %361, %359 : vector<2x32xf32>
    %363 = arith.mulf %354, %339 : vector<2x32xf32>
    %364 = arith.addf %362, %363 : vector<2x32xf32>
    %365 = vector.extract_strided_slice %238 {offsets = [10, 0], sizes = [2, 96], strides = [1, 1]} : vector<16x96xf32> to vector<2x96xf32>
    %366 = arith.truncf %364 : vector<2x32xf32> to vector<2x32xbf16>
    %cst_85 = arith.constant dense<0.000000e+00> : vector<2x96xf32>
    %367 = tpu.matmul %366, %4, %cst_85 {dimension_numbers = #tpu.dot_dimension_numbers<[1], [0], [0], [1], [0, 0, 1, 1], [], []>} : vector<2x32xbf16>, vector<32x96xbf16>, vector<2x96xf32> -> vector<2x96xf32>
    %368 = vector.broadcast %8 : vector<1x96xf32> to vector<2x96xf32>
    %369 = arith.addf %367, %368 : vector<2x96xf32>
    %370 = vector.extract_strided_slice %365 {offsets = [0, 0], sizes = [2, 64], strides = [1, 1]} : vector<2x96xf32> to vector<2x64xf32>
    %371 = vector.extract_strided_slice %369 {offsets = [0, 0], sizes = [2, 64], strides = [1, 1]} : vector<2x96xf32> to vector<2x64xf32>
    %372 = arith.addf %370, %371 : vector<2x64xf32>
    %373 = arith.negf %372 : vector<2x64xf32>
    %374 = math.exp %373 : vector<2x64xf32>
    %cst_86 = arith.constant 1.000000e+00 : f32
    %375 = vector.broadcast %cst_86 : f32 to vector<2x64xf32>
    %376 = arith.addf %375, %374 : vector<2x64xf32>
    %377 = arith.divf %375, %376 : vector<2x64xf32>
    %378 = vector.extract_strided_slice %377 {offsets = [0, 0], sizes = [2, 32], strides = [1, 1]} : vector<2x64xf32> to vector<2x32xf32>
    %379 = vector.extract_strided_slice %377 {offsets = [0, 32], sizes = [2, 32], strides = [1, 1]} : vector<2x64xf32> to vector<2x32xf32>
    %380 = vector.extract_strided_slice %365 {offsets = [0, 64], sizes = [2, 32], strides = [1, 1]} : vector<2x96xf32> to vector<2x32xf32>
    %381 = vector.extract_strided_slice %369 {offsets = [0, 64], sizes = [2, 32], strides = [1, 1]} : vector<2x96xf32> to vector<2x32xf32>
    %382 = arith.mulf %378, %381 : vector<2x32xf32>
    %383 = arith.addf %380, %382 : vector<2x32xf32>
    %384 = math.tanh %383 : vector<2x32xf32>
    %cst_87 = arith.constant 1.000000e+00 : f32
    %385 = vector.broadcast %cst_87 : f32 to vector<2x32xf32>
    %386 = arith.subf %385, %379 : vector<2x32xf32>
    %387 = arith.mulf %386, %384 : vector<2x32xf32>
    %388 = arith.mulf %379, %364 : vector<2x32xf32>
    %389 = arith.addf %387, %388 : vector<2x32xf32>
    %390 = vector.extract_strided_slice %238 {offsets = [12, 0], sizes = [2, 96], strides = [1, 1]} : vector<16x96xf32> to vector<2x96xf32>
    %391 = arith.truncf %389 : vector<2x32xf32> to vector<2x32xbf16>
    %cst_88 = arith.constant dense<0.000000e+00> : vector<2x96xf32>
    %392 = tpu.matmul %391, %4, %cst_88 {dimension_numbers = #tpu.dot_dimension_numbers<[1], [0], [0], [1], [0, 0, 1, 1], [], []>} : vector<2x32xbf16>, vector<32x96xbf16>, vector<2x96xf32> -> vector<2x96xf32>
    %393 = vector.broadcast %8 : vector<1x96xf32> to vector<2x96xf32>
    %394 = arith.addf %392, %393 : vector<2x96xf32>
    %395 = vector.extract_strided_slice %390 {offsets = [0, 0], sizes = [2, 64], strides = [1, 1]} : vector<2x96xf32> to vector<2x64xf32>
    %396 = vector.extract_strided_slice %394 {offsets = [0, 0], sizes = [2, 64], strides = [1, 1]} : vector<2x96xf32> to vector<2x64xf32>
    %397 = arith.addf %395, %396 : vector<2x64xf32>
    %398 = arith.negf %397 : vector<2x64xf32>
    %399 = math.exp %398 : vector<2x64xf32>
    %cst_89 = arith.constant 1.000000e+00 : f32
    %400 = vector.broadcast %cst_89 : f32 to vector<2x64xf32>
    %401 = arith.addf %400, %399 : vector<2x64xf32>
    %402 = arith.divf %400, %401 : vector<2x64xf32>
    %403 = vector.extract_strided_slice %402 {offsets = [0, 0], sizes = [2, 32], strides = [1, 1]} : vector<2x64xf32> to vector<2x32xf32>
    %404 = vector.extract_strided_slice %402 {offsets = [0, 32], sizes = [2, 32], strides = [1, 1]} : vector<2x64xf32> to vector<2x32xf32>
    %405 = vector.extract_strided_slice %390 {offsets = [0, 64], sizes = [2, 32], strides = [1, 1]} : vector<2x96xf32> to vector<2x32xf32>
    %406 = vector.extract_strided_slice %394 {offsets = [0, 64], sizes = [2, 32], strides = [1, 1]} : vector<2x96xf32> to vector<2x32xf32>
    %407 = arith.mulf %403, %406 : vector<2x32xf32>
    %408 = arith.addf %405, %407 : vector<2x32xf32>
    %409 = math.tanh %408 : vector<2x32xf32>
    %cst_90 = arith.constant 1.000000e+00 : f32
    %410 = vector.broadcast %cst_90 : f32 to vector<2x32xf32>
    %411 = arith.subf %410, %404 : vector<2x32xf32>
    %412 = arith.mulf %411, %409 : vector<2x32xf32>
    %413 = arith.mulf %404, %389 : vector<2x32xf32>
    %414 = arith.addf %412, %413 : vector<2x32xf32>
    %415 = vector.extract_strided_slice %238 {offsets = [14, 0], sizes = [2, 96], strides = [1, 1]} : vector<16x96xf32> to vector<2x96xf32>
    %416 = arith.truncf %414 : vector<2x32xf32> to vector<2x32xbf16>
    %cst_91 = arith.constant dense<0.000000e+00> : vector<2x96xf32>
    %417 = tpu.matmul %416, %4, %cst_91 {dimension_numbers = #tpu.dot_dimension_numbers<[1], [0], [0], [1], [0, 0, 1, 1], [], []>} : vector<2x32xbf16>, vector<32x96xbf16>, vector<2x96xf32> -> vector<2x96xf32>
    %418 = vector.broadcast %8 : vector<1x96xf32> to vector<2x96xf32>
    %419 = arith.addf %417, %418 : vector<2x96xf32>
    %420 = vector.extract_strided_slice %415 {offsets = [0, 0], sizes = [2, 64], strides = [1, 1]} : vector<2x96xf32> to vector<2x64xf32>
    %421 = vector.extract_strided_slice %419 {offsets = [0, 0], sizes = [2, 64], strides = [1, 1]} : vector<2x96xf32> to vector<2x64xf32>
    %422 = arith.addf %420, %421 : vector<2x64xf32>
    %423 = arith.negf %422 : vector<2x64xf32>
    %424 = math.exp %423 : vector<2x64xf32>
    %cst_92 = arith.constant 1.000000e+00 : f32
    %425 = vector.broadcast %cst_92 : f32 to vector<2x64xf32>
    %426 = arith.addf %425, %424 : vector<2x64xf32>
    %427 = arith.divf %425, %426 : vector<2x64xf32>
    %428 = vector.extract_strided_slice %427 {offsets = [0, 0], sizes = [2, 32], strides = [1, 1]} : vector<2x64xf32> to vector<2x32xf32>
    %429 = vector.extract_strided_slice %427 {offsets = [0, 32], sizes = [2, 32], strides = [1, 1]} : vector<2x64xf32> to vector<2x32xf32>
    %430 = vector.extract_strided_slice %415 {offsets = [0, 64], sizes = [2, 32], strides = [1, 1]} : vector<2x96xf32> to vector<2x32xf32>
    %431 = vector.extract_strided_slice %419 {offsets = [0, 64], sizes = [2, 32], strides = [1, 1]} : vector<2x96xf32> to vector<2x32xf32>
    %432 = arith.mulf %428, %431 : vector<2x32xf32>
    %433 = arith.addf %430, %432 : vector<2x32xf32>
    %434 = math.tanh %433 : vector<2x32xf32>
    %cst_93 = arith.constant 1.000000e+00 : f32
    %435 = vector.broadcast %cst_93 : f32 to vector<2x32xf32>
    %436 = arith.subf %435, %429 : vector<2x32xf32>
    %437 = arith.mulf %436, %434 : vector<2x32xf32>
    %438 = arith.mulf %429, %414 : vector<2x32xf32>
    %439 = arith.addf %437, %438 : vector<2x32xf32>
    %c0_94 = arith.constant 0 : index
    %c0_95 = arith.constant 0 : index
    %440 = vector.load %arg3[%c0_94, %c0_95] : memref<2x96xf32, #tpu.memory_space<vmem>>, vector<2x64xf32>
    tpu.vector_store %arg3[%c0_94, %c0_95], %227 {strides = array<i32>} : memref<2x96xf32, #tpu.memory_space<vmem>>, vector<2x64xf32>,
    %c0_96 = arith.constant 0 : index
    %c64 = arith.constant 64 : index
    %441 = vector.load %arg3[%c0_96, %c64] : memref<2x96xf32, #tpu.memory_space<vmem>>, vector<2x32xf32>
    tpu.vector_store %arg3[%c0_96, %c64], %439 {strides = array<i32>} : memref<2x96xf32, #tpu.memory_space<vmem>>, vector<2x32xf32>,
    return
  }
}

</mosaic_0001>

<bundles_post_ra>
// kernel: tpu_custom_call.1
= control target key start
LH: loop header
LB: loop body
LE: loop exit
PB: predicated region body
PF: predicated region fallthrough
CT: control target
= control target key end

     0   :  { %vm89_vm0 = vcmask 1043456   ;;  %v1960_v3 = vmov 0   ;;  %vm85_vm1 = vcmask 195584   ;;  %s2410_s0 = inlined_call_operand.vmem [shape: bf16[16,24], index: 0, kind: input, shape index: {}]   ;;  %s2411_s1 = inlined_call_operand.vmem [shape: bf16[248,192], index: 1, kind: input, shape index: {}]   ;;  %s2412_s2 = inlined_call_operand.vmem [shape: f32[4,192], index: 2, kind: input, shape index: {}]   ;;  %s2413_s3 = inlined_call_operand.hbm [shape: f32[2,96], index: 3, kind: output, shape index: {}]  }
   0x1   :  { %v1990_v0 = vld [vmem:[%s2411_s1 + $0x4c] ss:$8 sps:$4 sm:$0xff]   ;;  %v1995_v1 = vld [vmem:[%s2411_s1 + $0x48] ss:$8 sps:$4 sm:$0xff]   ;;  %128 = vmatprep.mubr.bf16.mxu0 %v1960_v3  ;;  %226 = vmatprep.mubr.bf16.mxu1 %v1960_v3  ;;  %v2006_v6 = vld [vmem:[%s2411_s1 + $0x3c] ss:$8 sps:$4 sm:$0xff]  }
   0x2   :  { %v18_v2 = vld [vmem:[%s2411_s1 + $0x10] sm:$0xff]  ;;  %202 = vmatprep.subr.bf16.mxu1 %v1990_v0  ;;  %v2011_v7 = vld [vmem:[%s2411_s1 + $0x38] ss:$8 sps:$4 sm:$0xff]   ;;  %v1822_v8 = vld [vmem:[%s2411_s1 + $0x4] ss:$8 sps:$4 sm:$0xff]  }
   0x3   :  { %v1630_v4 = vcombine.high %v18_v2, %v18_v2  ;;  %v1629_v5 = vcombine.low %v18_v2, %v18_v2  ;;  %203 = vmatpush1.bf16.msra.mxu1 %v1995_v1  ;;  %v1824_v10 = vld [vmem:[%s2411_s1] ss:$8 sps:$4 sm:$0xff]   ;;  %v2024_v11 = vld [vmem:[%s2411_s1 + $0x2c] ss:$8 sps:$4 sm:$0xff]   ;;  %v2039_v14 = vld [vmem:[%s2411_s1 + $0x1c] ss:$8 sps:$4 sm:$0xff]  }
   0x4   :  { %204 = vmatprep.subr.bf16.mxu1 %v2006_v6  ;;  %v2030_v12 = vld [vmem:[%s2411_s1 + $0x28] ss:$8 sps:$4 sm:$0xff]   ;;  %v1828_v13 = vld [vmem:[%s2410_s0] sm:$0xff]  }
   0x5   :  { %1631 = vmatprep.subr.msk.bf16.mxu0 %vm89_vm0, %v1630_v4  ;;  %v91_v9 = vsel %vm89_vm0, %v1629_v5, 0  ;;  %v2044_v15 = vld [vmem:[%s2411_s1 + $0x18] ss:$8 sps:$4 sm:$0xff]  }
   0x6   :  { %109 = vmatpush1.bf16.msra.mxu0 %v91_v9 }
   0x7   :  { %110 = vmatprep.subr.bf16.mxu0 %v1822_v8  ;;  %205 = vmatpush1.bf16.msra.mxu1 %v2011_v7 }
   0x8   :  { %206 = vmatprep.subr.bf16.mxu1 %v2024_v11 }
   0xa   :  { %111 = vmatpush1.bf16.msra.mxu0 %v1824_v10 }
   0xb   :  { %275 = vmatprep.subr.bf16.mxu0 %v1990_v0  ;;  %207 = vmatpush1.bf16.msra.mxu1 %v2030_v12 }
   0xc   :  { %208 = vmatprep.subr.bf16.mxu1 %v2039_v14 }
   0xd   :  { %1632 = vmatmul.mubr.msk.bf16.vlgmr.msra.gmra.mxu0 %vm85_vm1, %v1828_v13 }
   0xe   :  { %276 = vmatpush1.bf16.msra.mxu0 %v1995_v1  ;;  %299 = vmatprep.mubr.bf16.mxu0 %v1960_v3 }
   0xf   :  { %277 = vmatprep.subr.bf16.mxu0 %v2006_v6  ;;  %209 = vmatpush1.bf16.msra.mxu1 %v2044_v15 }
  0x10   :  { %8 = vsyncpa [#allocation5], 0  ;;  %357 = vmatprep.subr.bf16.mxu1 %v1990_v0  ;;  %v55_v16 = vlaneseq  ;;  %v47_v19 = vld [vmem:[%s2412_s2] ss:$4 sm:$0x3]  ;;  %s1961_s12 = smov 64  }
  0x11   :  { %v1625_v20 = vld [vmem:[%s2412_s2 + $0x1] ss:$4 sm:$0x3]  ;;  %vm190_vm2 = vcmask 523264   ;;  %vm257_vm3 = vcmask 517120   ;;  %vm420_vm4 = vcmask 521220  }
  0x12   :  { %278 = vmatpush1.bf16.msra.mxu0 %v2011_v7  ;;  %227 = vmatmul.mubr.bf16.vlgmr.msra.gmra.mxu1 %v1960_v3  ;;  %v56_v17 = vshrl.u32 %v55_v16, 7  ;;  %vm1963_vm5 = vmmov 0   ;;  %vm338_vm6 = vcmask 519170   ;;  %vm502_vm7 = vcmask 523270   ;;  %s1965_s0 = smov 32   ;;  %s1966_s9 = smov [#allocation4]  }
  0x13   :  { %279 = vmatprep.subr.bf16.mxu0 %v2024_v11  ;;  %358 = vmatpush1.bf16.msra.mxu1 %v1995_v1  ;;  %vm986_vm8 = vcmask 261120   ;;  %s1617_s10 = sshll.u32 %s1966_s9, 4  ;;  %vm1609_vm9 = vcmask 785926   ;;  %s1618_s10 = int_to_ptr.vmem [resolvable:$true] %s1617_s10 }
  0x14   :  { %381 = vmatprep.mubr.bf16.mxu1 %v1960_v3  ;;  %359 = vmatprep.subr.bf16.mxu1 %v2006_v6  ;;  %v57_v18 = vsub.s32 0, %v56_v17  ;;  %v61_v37 = vsub.s32 1, %v56_v17  ;;  %s1938_s11 = scalar_lea.vmem %s1618_s10, 32  ;;  %p1943_p1 = scmp.lt.s32.totalorder %s1618_s10, %s1618_s10 }
  0x15   :  { %p1939_p0 = scmp.ne.s32.totalorder %s1618_s10, %s1938_s11  ;;  %p1944_p2 = scmp.lt.s32.totalorder %s1938_s11, %s1938_s11 }
  0x16   :  { %280 = vmatpush1.bf16.msra.mxu0 %v2030_v12  ;;  %v58_v22 = vrot.slane %v47_v19, %v57_v18  ;;  %v2076_v24 = vrot.slane %v1625_v20, %v57_v18  ;;  %v2084_v38 = vrot.slane %v1625_v20, %v61_v37  ;;  %v2086_v39 = vrot.slane %v47_v19, %v61_v37 }
  0x17   :  { %281 = vmatprep.subr.bf16.mxu0 %v2039_v14  ;;  %360 = vmatpush1.bf16.msra.mxu1 %v2011_v7  ;;  %p1945_p3 = por %p1944_p2, %p1943_p1 }
  0x18   :  { %361 = vmatprep.subr.bf16.mxu1 %v2024_v11 }
  0x19   :  { %p1946_p4 = pnand %p1945_p3, %p1939_p0 }
  0x1a   :  { %282 = vmatpush1.bf16.msra.mxu0 %v2044_v15 }
  0x1b   :  { %439 = vmatprep.subr.bf16.mxu0 %v1990_v0  ;;  %362 = vmatpush1.bf16.msra.mxu1 %v2030_v12 }
  0x1c   :  { %363 = vmatprep.subr.bf16.mxu1 %v2039_v14 }
  0x1f   :  { %364 = vmatpush1.bf16.msra.mxu1 %v2044_v15 }
  0x20   :  { %521 = vmatprep.subr.bf16.mxu1 %v1990_v0 }
  0xcd   :  { %v130_v21 = vpop.f32.mrf.mxu0 }
  0xce   :  { %v2078_v26 = vadd.f32 %v130_v21, %v58_v22 }
  0xcf   :  { %v132_v23 = vpop.f32.mrf.mxu0 }
  0xd0   :  { %v2090_v42 = vadd.f32 %v132_v23, %v2086_v39 }
  0xd1   :  { %v134_v25 = vpop.f32.mrf.mxu0 }
  0xd2   :  { %v2080_v27 = vadd.f32 %v134_v25, %v58_v22  ;;  %v228_v28 = vpop.f32.mrf.mxu1 }
  0xd3   :  { %v229_v29 = vadd.f32 %v228_v28, %v2076_v24  ;;  %v2109_v53 = vpop.f32.mrf.mxu0 }
  0xd4   :  { %v230_v30 = vpop.f32.mrf.mxu1 }
  0xd5   :  { %v235_v31 = vadd.f32 %v229_v29, %v2078_v26  ;;  %v231_v40 = vadd.f32 %v230_v30, %v2084_v38 }
  0xd6   :  { %v232_v32 = vpop.f32.mrf.mxu1 }
  0xd7   :  { %v1641_v33 = vmul.f32 -1.442695, %v235_v31 }
  0xd8   :  { %v233_v34 = vpop.f32.mrf.mxu1 }
  0xd9   :  { %1842 = vpow2.f32 %v1641_v33 }
  0xe6   :  { %v1843_v35 = vpop.eup %1842 }
  0xe7   :  { %v239_v36 = vadd.f32 1.0, %v1843_v35 }
  0xe9   :  { %1844 = vrcp.f32 %v239_v36 }
  0xf6   :  { %v1845_v41 = vpop.eup %1844 }
  0xf7   :  { %v242_v43 = vmul.f32 %v1845_v41, %v231_v40  ;;  %v245_v46 = vsub.f32 1.0, %v1845_v41  ;;  %v251_v48 = vmul.f32 0.0, %v1845_v41 }
  0xf9   :  { %v243_v44 = vadd.f32 %v242_v43, %v2090_v42 }
  0xfb   :  { %1846 = vtanh.f32 %v243_v44 }
 0x108   :  { %v1847_v45 = vpop.eup %1846 }
 0x109   :  { %247 = vrot.lane.b32.xlu0 %v1847_v45, %s1961_s12 }
 0x17b   :  { %v248_v47 = vpop.permute.xlu0 %247 }
 0x17c   :  { %v250_v49 = vmul.f32 %v248_v47, %v245_v46 }
 0x17e   :  { %v2094_v50 = vadd.f32 %v251_v48, %v250_v49 }
 0x180   :  { %v260_v51 = vpack.c.bf16 %v2094_v50, %v2094_v50  ;;  %v330_v16 = vrot.slane %v2094_v50, 6 }
 0x182   :  { %262 = vrot.lane.b32.xlu0 %v260_v51, %s1961_s12 }
 0x1f4   :  { %v263_v52 = vpop.permute.xlu0 %262 }
 0x1f5   :  { %1642 = vmatmul.mubr.msk.bf16.vlgmr.msra.gmra.mxu0 %vm190_vm2, %v263_v52 }
 0x1f6   :  { %440 = vmatpush1.bf16.msra.mxu0 %v1995_v1  ;;  %463 = vmatprep.mubr.bf16.mxu0 %v1960_v3 }
 0x1f7   :  { %441 = vmatprep.subr.bf16.mxu0 %v2006_v6 }
 0x1fa   :  { %442 = vmatpush1.bf16.msra.mxu0 %v2011_v7 }
 0x1fb   :  { %443 = vmatprep.subr.bf16.mxu0 %v2024_v11 }
 0x1fe   :  { %444 = vmatpush1.bf16.msra.mxu0 %v2030_v12 }
 0x1ff   :  { %445 = vmatprep.subr.bf16.mxu0 %v2039_v14 }
 0x202   :  { %446 = vmatpush1.bf16.msra.mxu0 %v2044_v15 }
 0x203   :  { %595 = vmatprep.subr.bf16.mxu0 %v1990_v0 }
 0x2b5   :  { %v301_v54 = vpop.f32.mrf.mxu0 }
 0x2b6   :  { %v302_v55 = vadd.f32 %v301_v54, %v2076_v24 }
 0x2b7   :  { %v303_v56 = vpop.f32.mrf.mxu0 }
 0x2b8   :  { %v309_v57 = vrot.slane %v302_v55, 6  ;;  %v304_v2 = vadd.f32 %v303_v56, %v2084_v38 }
 0x2b9   :  { %v305_v58 = vpop.f32.mrf.mxu0 }
 0x2ba   :  { %v311_v59 = vadd.f32 %v309_v57, %v2078_v26  ;;  %v319_v4 = vrot.slane %v304_v2, 6 }
 0x2bb   :  { %v306_v60 = vpop.f32.mrf.mxu0 }
 0x2bc   :  { %v1643_v61 = vmul.f32 -1.442695, %v311_v59 }
 0x2be   :  { %1848 = vpow2.f32 %v1643_v61 }
 0x2cb   :  { %v1849_v62 = vpop.eup %1848 }
 0x2cc   :  { %v315_v63 = vadd.f32 1.0, %v1849_v62 }
 0x2ce   :  { %1850 = vrcp.f32 %v315_v63 }
 0x2db   :  { %v1851_v5 = vpop.eup %1850 }
 0x2dc   :  { %v321_v8 = vmul.f32 %v1851_v5, %v319_v4  ;;  %v324_v13 = vsub.f32 1.0, %v1851_v5  ;;  %v332_v18 = vmul.f32 %v1851_v5, %v330_v16 }
 0x2de   :  { %v322_v9 = vadd.f32 %v321_v8, %v2090_v42 }
 0x2e0   :  { %1852 = vtanh.f32 %v322_v9 }
 0x2ed   :  { %v1853_v10 = vpop.eup %1852 }
 0x2ee   :  { %326 = vrot.lane.b32.xlu1 %v1853_v10, %s1961_s12 }
 0x360   :  { %v327_v17 = vpop.permute.xlu1 %326 }
 0x361   :  { %v329_v19 = vmul.f32 %v327_v17, %v324_v13 }
 0x363   :  { %v2117_v20 = vadd.f32 %v332_v18, %v329_v19 }
 0x365   :  { %v341_v21 = vpack.c.bf16 %v2117_v20, %v2117_v20  ;;  %v412_v47 = vrot.slane %v2117_v20, 6 }
 0x367   :  { %v343_v22 = vrot.slane %v341_v21, 1 }
 0x369   :  { %344 = vrot.lane.b32.xlu1 %v343_v22, %s1961_s12 }
 0x3db   :  { %v345_v23 = vpop.permute.xlu1 %344 }
 0x3dc   :  { %1644 = vmatmul.mubr.msk.bf16.vlgmr.msra.gmra.mxu1 %vm190_vm2, %v345_v23 }
 0x3dd   :  { %522 = vmatpush1.bf16.msra.mxu1 %v1995_v1  ;;  %545 = vmatprep.mubr.bf16.mxu1 %v1960_v3 }
 0x3de   :  { %523 = vmatprep.subr.bf16.mxu1 %v2006_v6 }
 0x3e1   :  { %524 = vmatpush1.bf16.msra.mxu1 %v2011_v7 }
 0x3e2   :  { %525 = vmatprep.subr.bf16.mxu1 %v2024_v11 }
 0x3e5   :  { %526 = vmatpush1.bf16.msra.mxu1 %v2030_v12 }
 0x3e6   :  { %527 = vmatprep.subr.bf16.mxu1 %v2039_v14 }
 0x3e9   :  { %528 = vmatpush1.bf16.msra.mxu1 %v2044_v15 }
 0x3ea   :  { %676 = vmatprep.subr.bf16.mxu1 %v1990_v0 }
 0x49c   :  { %v383_v25 = vpop.f32.mrf.mxu1 }
 0x49d   :  { %v384_v28 = vadd.f32 %v383_v25, %v2076_v24 }
 0x49e   :  { %v385_v29 = vpop.f32.mrf.mxu1 }
 0x49f   :  { %v391_v30 = vrot.slane %v384_v28, 4  ;;  %v386_v37 = vadd.f32 %v385_v29, %v2084_v38 }
 0x4a0   :  { %v387_v31 = vpop.f32.mrf.mxu1 }
 0x4a1   :  { %v393_v32 = vadd.f32 %v391_v30, %v2078_v26  ;;  %v401_v40 = vrot.slane %v386_v37, 4 }
 0x4a2   :  { %v388_v33 = vpop.f32.mrf.mxu1 }
 0x4a3   :  { %v1645_v34 = vmul.f32 -1.442695, %v393_v32 }
 0x4a5   :  { %1854 = vpow2.f32 %v1645_v34 }
 0x4b2   :  { %v1855_v35 = vpop.eup %1854 }
 0x4b3   :  { %v397_v36 = vadd.f32 1.0, %v1855_v35 }
 0x4b5   :  { %1856 = vrcp.f32 %v397_v36 }
 0x4c2   :  { %v1857_v41 = vpop.eup %1856 }
 0x4c3   :  { %v403_v43 = vmul.f32 %v1857_v41, %v401_v40  ;;  %v406_v46 = vsub.f32 1.0, %v1857_v41  ;;  %v414_v49 = vmul.f32 %v1857_v41, %v412_v47  ;;  %v2178_v41 = vadd.f32 %v2109_v53, %v2086_v39 }
 0x4c5   :  { %v404_v44 = vadd.f32 %v403_v43, %v2090_v42 }
 0x4c7   :  { %1858 = vtanh.f32 %v404_v44 }
 0x4d4   :  { %v1859_v45 = vpop.eup %1858 }
 0x4d5   :  { %408 = vrot.lane.b32.xlu0 %v1859_v45, %s1961_s12 }
 0x547   :  { %v409_v48 = vpop.permute.xlu0 %408 }
 0x548   :  { %v411_v51 = vmul.f32 %v409_v48, %v406_v46 }
 0x54a   :  { %v2138_v52 = vadd.f32 %v414_v49, %v411_v51 }
 0x54c   :  { %v423_v54 = vpack.c.bf16 %v2138_v52, %v2138_v52 }
 0x54e   :  { %v425_v55 = vrot.slane %v423_v54, 2 }
 0x550   :  { %426 = vrot.lane.b32.xlu1 %v425_v55, %s1961_s12 }
 0x5c2   :  { %v427_v56 = vpop.permute.xlu1 %426 }
 0x5c3   :  { %1646 = vmatmul.mubr.msk.bf16.vlgmr.msra.gmra.mxu0 %vm190_vm2, %v427_v56 }
 0x5c4   :  { %596 = vmatpush1.bf16.msra.mxu0 %v1995_v1  ;;  %619 = vmatprep.mubr.bf16.mxu0 %v1960_v3 }
 0x5c5   :  { %597 = vmatprep.subr.bf16.mxu0 %v2006_v6 }
 0x5c8   :  { %598 = vmatpush1.bf16.msra.mxu0 %v2011_v7 }
 0x5c9   :  { %599 = vmatprep.subr.bf16.mxu0 %v2024_v11 }
 0x5cc   :  { %600 = vmatpush1.bf16.msra.mxu0 %v2030_v12 }
 0x5cd   :  { %601 = vmatprep.subr.bf16.mxu0 %v2039_v14 }
 0x5d0   :  { %602 = vmatpush1.bf16.msra.mxu0 %v2044_v15 }
 0x5d1   :  { %757 = vmatprep.subr.bf16.mxu0 %v1990_v0 }
 0x683   :  { %v465_v57 = vpop.f32.mrf.mxu0 }
 0x684   :  { %v466_v58 = vadd.f32 %v465_v57, %v2076_v24 }
 0x685   :  { %v467_v59 = vpop.f32.mrf.mxu0 }
 0x686   :  { %v473_v60 = vrot.slane %v466_v58, 2  ;;  %v468_v8 = vadd.f32 %v467_v59, %v2084_v38 }
 0x687   :  { %v469_v61 = vpop.f32.mrf.mxu0 }
 0x688   :  { %v475_v62 = vadd.f32 %v473_v60, %v2078_v26  ;;  %v483_v9 = vrot.slane %v468_v8, 2  ;;  %v494_v26 = vrot.slane %v2138_v52, 6 }
 0x689   :  { %v470_v63 = vpop.f32.mrf.mxu0 }
 0x68a   :  { %v1647_v2 = vmul.f32 -1.442695, %v475_v62 }
 0x68c   :  { %1860 = vpow2.f32 %v1647_v2 }
 0x699   :  { %v1861_v4 = vpop.eup %1860 }
 0x69a   :  { %v479_v5 = vadd.f32 1.0, %v1861_v4 }
 0x69c   :  { %1862 = vrcp.f32 %v479_v5 }
 0x6a9   :  { %v1863_v10 = vpop.eup %1862 }
 0x6aa   :  { %v485_v13 = vmul.f32 %v1863_v10, %v483_v9  ;;  %v488_v17 = vsub.f32 1.0, %v1863_v10  ;;  %v496_v19 = vmul.f32 %v1863_v10, %v494_v26 }
 0x6ac   :  { %v486_v0 = vadd.f32 %v485_v13, %v2090_v42 }
 0x6ae   :  { %1864 = vtanh.f32 %v486_v0 }
 0x6bb   :  { %v1865_v16 = vpop.eup %1864 }
 0x6bc   :  { %490 = vrot.lane.b32.xlu0 %v1865_v16, %s1961_s12 }
 0x72e   :  { %v491_v18 = vpop.permute.xlu0 %490 }
 0x72f   :  { %v493_v21 = vmul.f32 %v491_v18, %v488_v17 }
 0x731   :  { %v2159_v22 = vadd.f32 %v496_v19, %v493_v21 }
 0x733   :  { %v505_v23 = vpack.c.bf16 %v2159_v22, %v2159_v22  ;;  %v570_v47 = vrot.slane %v2159_v22, 6 }
 0x735   :  { %v507_v25 = vrot.slane %v505_v23, 3 }
 0x737   :  { %508 = vrot.lane.b32.xlu1 %v507_v25, %s1961_s12 }
 0x7a9   :  { %v509_v28 = vpop.permute.xlu1 %508 }
 0x7aa   :  { %1648 = vmatmul.mubr.msk.bf16.vlgmr.msra.gmra.mxu1 %vm190_vm2, %v509_v28 }
 0x7ab   :  { %677 = vmatpush1.bf16.msra.mxu1 %v1995_v1  ;;  %700 = vmatprep.mubr.bf16.mxu1 %v1960_v3 }
 0x7ac   :  { %678 = vmatprep.subr.bf16.mxu1 %v2006_v6 }
 0x7af   :  { %679 = vmatpush1.bf16.msra.mxu1 %v2011_v7 }
 0x7b0   :  { %680 = vmatprep.subr.bf16.mxu1 %v2024_v11 }
 0x7b3   :  { %681 = vmatpush1.bf16.msra.mxu1 %v2030_v12 }
 0x7b4   :  { %682 = vmatprep.subr.bf16.mxu1 %v2039_v14 }
 0x7b7   :  { %683 = vmatpush1.bf16.msra.mxu1 %v2044_v15 }
 0x86a   :  { %v547_v42 = vpop.f32.mrf.mxu1 }
 0x86b   :  { %v548_v29 = vadd.f32 %v547_v42, %v2076_v24 }
 0x86c   :  { %v549_v30 = vpop.f32.mrf.mxu1 }
 0x86d   :  { %v554_v31 = vadd.f32 %v548_v29, %v2080_v27  ;;  %v550_v37 = vadd.f32 %v549_v30, %v2084_v38 }
 0x86e   :  { %v551_v32 = vpop.f32.mrf.mxu1 }
 0x86f   :  { %v1649_v33 = vmul.f32 -1.442695, %v554_v31 }
 0x870   :  { %v552_v34 = vpop.f32.mrf.mxu1 }
 0x871   :  { %1866 = vpow2.f32 %v1649_v33 }
 0x87e   :  { %v1867_v35 = vpop.eup %1866 }
 0x87f   :  { %v558_v36 = vadd.f32 1.0, %v1867_v35 }
 0x881   :  { %1868 = vrcp.f32 %v558_v36 }
 0x88e   :  { %v1869_v40 = vpop.eup %1868 }
 0x88f   :  { %v561_v43 = vmul.f32 %v1869_v40, %v550_v37  ;;  %v564_v46 = vsub.f32 1.0, %v1869_v40  ;;  %v572_v49 = vmul.f32 %v1869_v40, %v570_v47 }
 0x891   :  { %v562_v44 = vadd.f32 %v561_v43, %v2178_v41 }
 0x893   :  { %1870 = vtanh.f32 %v562_v44 }
 0x8a0   :  { %v1871_v45 = vpop.eup %1870 }
 0x8a1   :  { %566 = vrot.lane.b32.xlu0 %v1871_v45, %s1961_s12 }
 0x913   :  { %v567_v48 = vpop.permute.xlu0 %566 }
 0x914   :  { %v569_v51 = vmul.f32 %v567_v48, %v564_v46 }
 0x916   :  { %v2183_v54 = vadd.f32 %v572_v49, %v569_v51 }
 0x918   :  { %v580_v55 = vpack.c.bf16 %v2183_v54, %v2183_v54  ;;  %v650_v4 = vrot.slane %v2183_v54, 6 }
 0x91a   :  { %582 = vrot.lane.b32.xlu1 %v580_v55, %s1961_s12 }
 0x98c   :  { %v583_v39 = vpop.permute.xlu1 %582 }
 0x98d   :  { %1650 = vmatmul.mubr.msk.bf16.vlgmr.msra.gmra.mxu0 %vm190_vm2, %v583_v39 }
 0x98e   :  { %758 = vmatpush1.bf16.msra.mxu0 %v1995_v1  ;;  %781 = vmatprep.mubr.bf16.mxu0 %v1960_v3 }
 0x98f   :  { %759 = vmatprep.subr.bf16.mxu0 %v2006_v6 }
 0x992   :  { %760 = vmatpush1.bf16.msra.mxu0 %v2011_v7 }
 0x993   :  { %761 = vmatprep.subr.bf16.mxu0 %v2024_v11 }
 0x996   :  { %762 = vmatpush1.bf16.msra.mxu0 %v2030_v12 }
 0x997   :  { %763 = vmatprep.subr.bf16.mxu0 %v2039_v14 }
 0x99a   :  { %764 = vmatpush1.bf16.msra.mxu0 %v2044_v15 }
 0xa4d   :  { %v621_v53 = vpop.f32.mrf.mxu0 }
 0xa4e   :  { %v622_v56 = vadd.f32 %v621_v53, %v2076_v24 }
 0xa4f   :  { %v623_v57 = vpop.f32.mrf.mxu0 }
 0xa50   :  { %v629_v58 = vrot.slane %v622_v56, 6  ;;  %v624_v11 = vadd.f32 %v623_v57, %v2084_v38 }
 0xa51   :  { %v625_v1 = vpop.f32.mrf.mxu0 }
 0xa52   :  { %v631_v59 = vadd.f32 %v629_v58, %v2080_v27  ;;  %v639_v12 = vrot.slane %v624_v11, 6 }
 0xa53   :  { %v626_v60 = vpop.f32.mrf.mxu0 }
 0xa54   :  { %v1651_v6 = vmul.f32 -1.442695, %v631_v59 }
 0xa56   :  { %1872 = vpow2.f32 %v1651_v6 }
 0xa63   :  { %v1873_v7 = vpop.eup %1872 }
 0xa64   :  { %v635_v61 = vadd.f32 1.0, %v1873_v7 }
 0xa66   :  { %1874 = vrcp.f32 %v635_v61 }
 0xa73   :  { %v1875_v14 = vpop.eup %1874 }
 0xa74   :  { %v641_v62 = vmul.f32 %v1875_v14, %v639_v12  ;;  %v644_v2 = vsub.f32 1.0, %v1875_v14  ;;  %v652_v8 = vmul.f32 %v1875_v14, %v650_v4  ;;  %v1838_v4 = vld [vmem:[%s2411_s1 + $0x98] ss:$8 sps:$4 sm:$0xff]  }
 0xa76   :  { %v642_v15 = vadd.f32 %v641_v62, %v2178_v41 }
 0xa78   :  { %1876 = vtanh.f32 %v642_v15  ;;  %v1833_v15 = vld [vmem:[%s2411_s1 + $0x88] ss:$8 sps:$4 sm:$0xff]  }
 0xa85   :  { %v1877_v63 = vpop.eup %1876 }
 0xa86   :  { %646 = vrot.lane.b32.xlu0 %v1877_v63, %s1961_s12  ;;  %v1835_v63 = vld [vmem:[%s2411_s1 + $0x78] ss:$8 sps:$4 sm:$0xff]  }
 0xaf8   :  { %v647_v5 = vpop.permute.xlu0 %646 }
 0xaf9   :  { %v649_v9 = vmul.f32 %v647_v5, %v644_v2  ;;  %v1836_v2 = vld [vmem:[%s2411_s1 + $0xa8] ss:$8 sps:$4 sm:$0xff]  }
 0xafb   :  { %v2203_v10 = vadd.f32 %v652_v8, %v649_v9 }
 0xafd   :  { %v660_v13 = vpack.c.bf16 %v2203_v10, %v2203_v10  ;;  %v731_v37 = vrot.slane %v2203_v10, 6 }
 0xaff   :  { %v662_v0 = vrot.slane %v660_v13, 1 }
 0xb01   :  { %663 = vrot.lane.b32.xlu1 %v662_v0, %s1961_s12 }
 0xb73   :  { %v664_v16 = vpop.permute.xlu1 %663 }
 0xb74   :  { %1652 = vmatmul.mubr.msk.bf16.vlgmr.msra.gmra.mxu1 %vm190_vm2, %v664_v16 }
 0xc34   :  { %v702_v17 = vpop.f32.mrf.mxu1 }
 0xc35   :  { %v703_v26 = vadd.f32 %v702_v17, %v2076_v24 }
 0xc36   :  { %v704_v18 = vpop.f32.mrf.mxu1 }
 0xc37   :  { %v710_v19 = vrot.slane %v703_v26, 4  ;;  %v705_v30 = vadd.f32 %v704_v18, %v2084_v38  ;;  %v2277_v18 = vld [vmem:[%s2411_s1 + $0xe8] ss:$8 sps:$4 sm:$0xff]  }
 0xc38   :  { %v706_v21 = vpop.f32.mrf.mxu1 }
 0xc39   :  { %v712_v23 = vadd.f32 %v710_v19, %v2080_v27  ;;  %v720_v31 = vrot.slane %v705_v30, 4 }
 0xc3a   :  { %v707_v25 = vpop.f32.mrf.mxu1 }
 0xc3b   :  { %v1653_v28 = vmul.f32 -1.442695, %v712_v23 }
 0xc3d   :  { %1878 = vpow2.f32 %v1653_v28 }
 0xc4a   :  { %v1879_v42 = vpop.eup %1878 }
 0xc4b   :  { %v716_v29 = vadd.f32 1.0, %v1879_v42  ;;  %v2285_v42 = vld [vmem:[%s2411_s1 + $0xd8] ss:$8 sps:$4 sm:$0xff]  }
 0xc4d   :  { %1880 = vrcp.f32 %v716_v29 }
 0xc5a   :  { %v1881_v32 = vpop.eup %1880 }
 0xc5b   :  { %v722_v33 = vmul.f32 %v1881_v32, %v720_v31  ;;  %v725_v36 = vsub.f32 1.0, %v1881_v32  ;;  %v733_v43 = vmul.f32 %v1881_v32, %v731_v37 }
 0xc5d   :  { %v723_v34 = vadd.f32 %v722_v33, %v2178_v41 }
 0xc5f   :  { %1882 = vtanh.f32 %v723_v34 }
 0xc6c   :  { %v1883_v35 = vpop.eup %1882 }
 0xc6d   :  { %727 = vrot.lane.b32.xlu0 %v1883_v35, %s1961_s12 }
 0xcdf   :  { %v728_v40 = vpop.permute.xlu0 %727 }
 0xce0   :  { %v730_v44 = vmul.f32 %v728_v40, %v725_v36 }
 0xce2   :  { %v734_v45 = vadd.f32 %v733_v43, %v730_v44  ;;  %v2311_v43 = vld [vmem:[%s2412_s2 + $0x3] ss:$0 sm:$0xff] }
 0xce4   :  { %v741_v46 = vpack.c.bf16 %v734_v45, %v734_v45  ;;  %v812_v61 = vrot.slane %v734_v45, 6 }
 0xce6   :  { %v743_v47 = vrot.slane %v741_v46, 2 }
 0xce8   :  { %744 = vrot.lane.b32.xlu1 %v743_v47, %s1961_s12 }
 0xcec   :  { %254 = vrot.lane.b32.xlu1 %v2094_v50, %s1961_s12 }
 0xcf0   :  { %417 = vrot.lane.b32.xlu1 %v2138_v52, %s1961_s12 }
 0xcf4   :  { %575 = vrot.lane.b32.xlu1 %v2183_v54, %s1961_s12 }
 0xcf8   :  { %736 = vrot.lane.b32.xlu1 %v734_v45, %s1961_s12 }
 0xd5a   :  { %v745_v48 = vpop.permute.xlu1 %744 }
 0xd5b   :  { %1654 = vmatmul.mubr.msk.bf16.vlgmr.msra.gmra.mxu0 %vm190_vm2, %v745_v48 }
 0xd5e   :  { %v255_v49 = vpop.permute.xlu1 %254 }
 0xd5f   :  { %258 = vst.msk [vmem:[#allocation2] sm:$0x3] %vm257_vm3, %v255_v49  ;;  %259 = vst.msk [vmem:[#allocation3 + $0xe] sm:$0x3] %vm257_vm3, %v255_v49 }
 0xd62   :  { %v418_v51 = vpop.permute.xlu1 %417 }
 0xd63   :  { %421 = vst.msk [vmem:[#allocation2] sm:$0x30] %vm420_vm4, %v418_v51  ;;  %422 = vst.msk [vmem:[#allocation3 + $0x6] sm:$0x30] %vm420_vm4, %v418_v51 }
 0xd66   :  { %v576_v50 = vpop.permute.xlu1 %575 }
 0xd67   :  { %578 = vst.msk [vmem:[#allocation2 + $0x8] sm:$0x3] %vm257_vm3, %v576_v50  ;;  %579 = vst.msk [vmem:[#allocation3 + $0x6] sm:$0x3] %vm257_vm3, %v576_v50 }
 0xd6a   :  { %v737_v52 = vpop.permute.xlu1 %736 }
 0xd6b   :  { %739 = vst.msk [vmem:[#allocation2 + $0x8] sm:$0x30] %vm420_vm4, %v737_v52  ;;  %740 = vst.msk [vmem:[#allocation3 - $0x2] sm:$0x30] %vm420_vm4, %v737_v52 }
 0xe1b   :  { %v783_v54 = vpop.f32.mrf.mxu0 }
 0xe1c   :  { %v784_v55 = vadd.f32 %v783_v54, %v2076_v24 }
 0xe1d   :  { %v785_v39 = vpop.f32.mrf.mxu0 }
 0xe1e   :  { %v791_v53 = vrot.slane %v784_v55, 2  ;;  %v786_v6 = vadd.f32 %v785_v39, %v2084_v38  ;;  %v1962_v38 = vmov 0.0  }
 0xe1f   :  { %v787_v56 = vpop.f32.mrf.mxu0  ;;  %1719 = vmatprep.subr.bf16.mxu1 %v1962_v38  ;;  %1731 = vmatprep.subr.bf16.mxu0 %v1962_v38 }
 0xe20   :  { %v793_v57 = vadd.f32 %v791_v53, %v2080_v27  ;;  %v801_v7 = vrot.slane %v786_v6, 2  ;;  %v1832_v27 = vld [vmem:[%s2411_s1 + $0xc8] ss:$8 sps:$4 sm:$0xff]   ;;  %1732 = vmatpush3.bf16.msra.mxu0 %v1833_v15  ;;  %1727 = vmatprep.mubr.msk.bf16.mxu1 %vm1963_vm5, %v1962_v38 }
 0xe21   :  { %v788_v58 = vpop.f32.mrf.mxu0  ;;  %1720 = vmatpush3.bf16.msra.mxu1 %v1832_v27  ;;  %1733 = vmatprep.subr.bf16.mxu0 %v1962_v38 }
 0xe22   :  { %v1655_v1 = vmul.f32 -1.442695, %v793_v57  ;;  %1721 = vmatprep.subr.bf16.mxu1 %v1962_v38  ;;  %1739 = vmatprep.mubr.msk.bf16.mxu0 %vm1963_vm5, %v1962_v38 }
 0xe24   :  { %1884 = vpow2.f32 %v1655_v1  ;;  %1734 = vmatpush3.bf16.msra.mxu0 %v1835_v63 }
 0xe25   :  { %1735 = vmatprep.subr.bf16.mxu0 %v1962_v38 }
 0xe31   :  { %v1885_v59 = vpop.eup %1884 }
 0xe32   :  { %v797_v60 = vadd.f32 1.0, %v1885_v59 }
 0xe34   :  { %1886 = vrcp.f32 %v797_v60 }
 0xe41   :  { %v1887_v11 = vpop.eup %1886 }
 0xe42   :  { %v803_v12 = vmul.f32 %v1887_v11, %v801_v7  ;;  %v814_v14 = vmul.f32 %v1887_v11, %v812_v61  ;;  %v806_v5 = vsub.f32 1.0, %v1887_v11 }
 0xe44   :  { %v804_v24 = vadd.f32 %v803_v12, %v2178_v41  ;;  %v1834_v41 = vld [vmem:[%s2411_s1 + $0xb8] ss:$8 sps:$4 sm:$0xff]  }
 0xe45   :  { %1722 = vmatpush3.bf16.msra.mxu1 %v1834_v41 }
 0xe46   :  { %1888 = vtanh.f32 %v804_v24  ;;  %1723 = vmatprep.subr.bf16.mxu1 %v1962_v38 }
 0xe49   :  { %1724 = vmatpush3.bf16.msra.mxu1 %v1836_v2 }
 0xe4a   :  { %1725 = vmatprep.subr.bf16.mxu1 %v1962_v38 }
 0xe4d   :  { %1726 = vmatpush3.bf16.msra.mxu1 %v1838_v4 }
 0xe4e   :  { %1743 = vmatprep.subr.bf16.mxu1 %v1962_v38 }
 0xe53   :  { %v1889_v62 = vpop.eup %1888 }
 0xe54   :  { %808 = vrot.lane.b32.xlu0 %v1889_v62, %s1961_s12 }
 0xe58   :  { %335 = vrot.lane.b32.xlu0 %v2117_v20, %s1961_s12  ;;  %v1837_v20 = vld [vmem:[%s2411_s1 + $0x68] ss:$8 sps:$4 sm:$0xff]  }
 0xe59   :  { %1736 = vmatpush3.bf16.msra.mxu0 %v1837_v20 }
 0xe5a   :  { %1737 = vmatprep.subr.bf16.mxu0 %v1962_v38 }
 0xe5c   :  { %499 = vrot.lane.b32.xlu0 %v2159_v22, %s1961_s12  ;;  %v1839_v22 = vld [vmem:[%s2411_s1 + $0x58] ss:$8 sps:$4 sm:$0xff]  }
 0xe5d   :  { %1738 = vmatpush3.bf16.msra.mxu0 %v1839_v22 }
 0xe5e   :  { %1751 = vmatprep.subr.bf16.mxu0 %v1962_v38 }
 0xe60   :  { %655 = vrot.lane.b32.xlu0 %v2203_v10, %s1961_s12 }
 0xec6   :  { %v809_v8 = vpop.permute.xlu0 %808 }
 0xec7   :  { %v811_v9 = vmul.f32 %v809_v8, %v806_v5 }
 0xec9   :  { %v815_v10 = vadd.f32 %v814_v14, %v811_v9 }
 0xeca   :  { %v336_v13 = vpop.permute.xlu0 %335 }
 0xecb   :  { %339 = vst.msk [vmem:[#allocation2] sm:$0xc] %vm338_vm6, %v336_v13  ;;  %340 = vst.msk [vmem:[#allocation3 + $0xa] sm:$0xc] %vm338_vm6, %v336_v13  ;;  %817 = vrot.lane.b32.xlu0 %v815_v10, %s1961_s12 }
 0xece   :  { %v500_v0 = vpop.permute.xlu0 %499 }
 0xecf   :  { %503 = vst.msk [vmem:[#allocation2] sm:$0xc0] %vm502_vm7, %v500_v0  ;;  %504 = vst.msk [vmem:[#allocation3 + $0x2] sm:$0xc0] %vm502_vm7, %v500_v0 }
 0xed2   :  { %v656_v16 = vpop.permute.xlu0 %655 }
 0xed3   :  { %658 = vst.msk [vmem:[#allocation2 + $0x8] sm:$0xc] %vm338_vm6, %v656_v16  ;;  %659 = vst.msk [vmem:[#allocation3 + $0x2] sm:$0xc] %vm338_vm6, %v656_v16 }
 0xed6   :  { %v826_v26 = vld [vmem:[#allocation3 + $0x8] sm:$0xff]  ;;  %v822_v21 = vld [vmem:[#allocation2] sm:$0xff] }
 0xf3d   :  { %v818_v17 = vpop.permute.xlu0 %817 }
 0xf3e   :  { %820 = vst.msk [vmem:[#allocation2 + $0x8] sm:$0xc0] %vm502_vm7, %v818_v17  ;;  %821 = vst.msk [vmem:[#allocation3 - $0x6] sm:$0xc0] %vm502_vm7, %v818_v17 }
 0xf3f   :  { %1604 = vst.msk [vmem:[#allocation4 - $0x6] sm:$0xc0] %vm502_vm7, %v818_v17 }
 0xf45   :  { %v825_v19 = vld [vmem:[#allocation3] sm:$0xff]  ;;  %v823_v23 = vld [vmem:[#allocation2 + $0x8] sm:$0xff] }
 0xf46   :  { %v827_v25 = vpack.c.bf16 %v826_v26, %v825_v19  ;;  %v824_v28 = vpack.c.bf16 %v823_v23, %v822_v21 }
 0xf48   :  { %1728 = vmatmul.mubr.msk.bf16.vlgmr.msra.gmra.mxu1 %vm190_vm2, %v827_v25  ;;  %1740 = vmatmul.mubr.msk.bf16.vlgmr.msra.gmra.mxu0 %vm190_vm2, %v824_v28 }
 0xf49   :  { %1744 = vmatpush3.bf16.msra.mxu1 %v2277_v18  ;;  %1747 = vmatprep.mubr.msk.bf16.mxu1 %vm1963_vm5, %v1962_v38 }
 0xf4a   :  { %1745 = vmatprep.subr.bf16.mxu1 %v1962_v38  ;;  %1752 = vmatpush3.bf16.msra.mxu0 %v2277_v18 }
 0xf4b   :  { %1753 = vmatprep.subr.bf16.mxu0 %v1962_v38  ;;  %1755 = vmatprep.mubr.msk.bf16.mxu0 %vm1963_vm5, %v1962_v38 }
 0xf4d   :  { %1746 = vmatpush3.bf16.msra.mxu1 %v2285_v42 }
 0xf4e   :  { %1754 = vmatpush3.bf16.msra.mxu0 %v2285_v42  ;;  %1759 = vmatprep.subr.bf16.mxu1 %v1962_v38 }
 0xf4f   :  { %1767 = vmatprep.subr.bf16.mxu0 %v1962_v38 }
 0xf50   :  { %1748 = vmatmul.mubr.bf16.vlgmr.msra.gmra.mxu1 %v1960_v3  ;;  %v1666_v3 = vld [vmem:[%s2412_s2 + $0x2] ss:$0 sm:$0xff]  ;;  %s1964_s2 = smov 96  }
 0xf51   :  { %1760 = vmatpush3.bf16.msra.mxu1 %v2277_v18  ;;  %1763 = vmatprep.mubr.msk.bf16.mxu1 %vm1963_vm5, %v1962_v38 }
 0xf52   :  { %1761 = vmatprep.subr.bf16.mxu1 %v1962_v38 }
 0xf55   :  { %1762 = vmatpush3.bf16.msra.mxu1 %v2285_v42 }
 0xf56   :  { %1775 = vmatprep.subr.bf16.mxu1 %v1962_v38 }
0x1008   :  { %v889_v29 = vpop.f32.mrf.mxu1  ;;  %v957_v30 = vpop.f32.mrf.mxu0 }
0x1009   :  { %v958_v31 = vadd.f32 %v957_v30, %v889_v29 }
0x100a   :  { %v1729_v32 = vpop.f32.mrf.mxu1  ;;  %v1741_v33 = vpop.f32.mrf.mxu0 }
0x100b   :  { %v2317_v51 = vadd.f32 %v1666_v3, %v958_v31 }
0x100c   :  { %v892_v34 = vpop.f32.mrf.mxu1  ;;  %v960_v35 = vpop.f32.mrf.mxu0 }
0x100d   :  { %v961_v36 = vadd.f32 %v960_v35, %v892_v34 }
0x100e   :  { %v1730_v37 = vpop.f32.mrf.mxu1  ;;  %v1742_v40 = vpop.f32.mrf.mxu0 }
0x100f   :  { %v2313_v44 = vadd.f32 %v1666_v3, %v961_v36 }
0x1010   :  { %v1023_v45 = vpop.f32.mrf.mxu1 }
0x1011   :  { %v1024_v46 = vadd.f32 %v2311_v43, %v1023_v45 }
0x1012   :  { %v1749_v47 = vpop.f32.mrf.mxu1 }
0x1013   :  { %1037 = vrot.lane.b32.xlu1 %v1024_v46, %s1961_s12  ;;  %v1029_v50 = vadd.f32 %v1024_v46, %v2317_v51 }
0x1014   :  { %v1026_v48 = vpop.f32.mrf.mxu1 }
0x1015   :  { %v1670_v52 = vmul.f32 -1.442695, %v1029_v50 }
0x1016   :  { %v1750_v49 = vpop.f32.mrf.mxu1 }
0x1017   :  { %1890 = vpow2.f32 %v1670_v52 }
0x1024   :  { %v1891_v54 = vpop.eup %1890 }
0x1025   :  { %v1033_v55 = vadd.f32 1.0, %v1891_v54 }
0x1027   :  { %1892 = vrcp.f32 %v1033_v55 }
0x1034   :  { %v1893_v39 = vpop.eup %1892 }
0x1035   :  { %v1047_v59 = vsub.f32 1.0, %v1893_v39  ;;  %v1053_v6 = vmul.f32 0.0, %v1893_v39 }
0x1085   :  { %v1038_v53 = vpop.permute.xlu1 %1037 }
0x1086   :  { %v1040_v56 = vmul.f32 %v1893_v39, %v1038_v53 }
0x1088   :  { %1042 = vrot.lane.b32.xlu0 %v1040_v56, %s1961_s12 }
0x10fa   :  { %v1043_v57 = vpop.permute.xlu0 %1042 }
0x10fb   :  { %v1045_v58 = vadd.f32 %v1043_v57, %v2317_v51 }
0x10fd   :  { %1894 = vtanh.f32 %v1045_v58 }
0x110a   :  { %v1895_v1 = vpop.eup %1894 }
0x110b   :  { %1049 = vrot.lane.b32.xlu1 %v1895_v1, %s1964_s2 }
0x117d   :  { %v1050_v60 = vpop.permute.xlu1 %1049 }
0x117e   :  { %v1052_v7 = vmul.f32 %v1050_v60, %v1047_v59 }
0x1180   :  { %v1054_v61 = vadd.f32 %v1053_v6, %v1052_v7 }
0x1182   :  { %v1055_v11 = vpack.c.bf16 %v1054_v61, %v1054_v61  ;;  %v1129_v0 = vrot.slane %v1054_v61, 6 }
0x1184   :  { %1057 = vrot.lane.b32.xlu0 %v1055_v11, %s1964_s2 }
0x11f6   :  { %v1058_v12 = vpop.permute.xlu0 %1057 }
0x11f7   :  { %1756 = vmatmul.mubr.msk.bf16.vlgmr.msra.gmra.mxu0 %vm986_vm8, %v1058_v12 }
0x11f8   :  { %1768 = vmatpush3.bf16.msra.mxu0 %v2277_v18  ;;  %1771 = vmatprep.mubr.msk.bf16.mxu0 %vm1963_vm5, %v1962_v38 }
0x11f9   :  { %1769 = vmatprep.subr.bf16.mxu0 %v1962_v38 }
0x11fc   :  { %1770 = vmatpush3.bf16.msra.mxu0 %v2285_v42 }
0x11fd   :  { %1783 = vmatprep.subr.bf16.mxu0 %v1962_v38 }
0x12b7   :  { %v1096_v14 = vpop.f32.mrf.mxu0 }
0x12b8   :  { %v1097_v24 = vadd.f32 %v2311_v43, %v1096_v14 }
0x12b9   :  { %v1757_v62 = vpop.f32.mrf.mxu0 }
0x12ba   :  { %v1103_v27 = vrot.slane %v1097_v24, 6 }
0x12bb   :  { %v1099_v15 = vpop.f32.mrf.mxu0 }
0x12bc   :  { %1112 = vrot.lane.b32.xlu1 %v1103_v27, %s1961_s12  ;;  %v1105_v63 = vadd.f32 %v1103_v27, %v2317_v51 }
0x12bd   :  { %v1758_v41 = vpop.f32.mrf.mxu0 }
0x12be   :  { %v1672_v2 = vmul.f32 -1.442695, %v1105_v63 }
0x12c0   :  { %1896 = vpow2.f32 %v1672_v2 }
0x12cd   :  { %v1897_v20 = vpop.eup %1896 }
0x12ce   :  { %v1109_v4 = vadd.f32 1.0, %v1897_v20 }
0x12d0   :  { %1898 = vrcp.f32 %v1109_v4 }
0x12dd   :  { %v1899_v22 = vpop.eup %1898 }
0x12de   :  { %v1122_v16 = vsub.f32 1.0, %v1899_v22  ;;  %v1131_v26 = vmul.f32 %v1899_v22, %v1129_v0 }
0x132e   :  { %v1113_v5 = vpop.permute.xlu1 %1112 }
0x132f   :  { %v1115_v8 = vmul.f32 %v1899_v22, %v1113_v5 }
0x1331   :  { %1117 = vrot.lane.b32.xlu0 %v1115_v8, %s1961_s12 }
0x13a3   :  { %v1118_v9 = vpop.permute.xlu0 %1117 }
0x13a4   :  { %v1120_v10 = vadd.f32 %v1118_v9, %v2317_v51 }
0x13a6   :  { %1900 = vtanh.f32 %v1120_v10 }
0x13b3   :  { %v1901_v13 = vpop.eup %1900 }
0x13b4   :  { %1124 = vrot.lane.b32.xlu1 %v1901_v13, %s1964_s2 }
0x1426   :  { %v1125_v17 = vpop.permute.xlu1 %1124 }
0x1427   :  { %v1127_v19 = vmul.f32 %v1125_v17, %v1122_v16 }
0x1429   :  { %v1132_v21 = vadd.f32 %v1131_v26, %v1127_v19 }
0x142b   :  { %v1133_v23 = vpack.c.bf16 %v1132_v21, %v1132_v21  ;;  %v1208_v50 = vrot.slane %v1132_v21, 6 }
0x142d   :  { %v1135_v25 = vrot.slane %v1133_v23, 1 }
0x142f   :  { %1136 = vrot.lane.b32.xlu0 %v1135_v25, %s1964_s2 }
0x14a1   :  { %v1137_v28 = vpop.permute.xlu0 %1136 }
0x14a2   :  { %1764 = vmatmul.mubr.msk.bf16.vlgmr.msra.gmra.mxu1 %vm986_vm8, %v1137_v28 }
0x14a3   :  { %1776 = vmatpush3.bf16.msra.mxu1 %v2277_v18  ;;  %1779 = vmatprep.mubr.msk.bf16.mxu1 %vm1963_vm5, %v1962_v38 }
0x14a4   :  { %1777 = vmatprep.subr.bf16.mxu1 %v1962_v38 }
0x14a7   :  { %1778 = vmatpush3.bf16.msra.mxu1 %v2285_v42 }
0x14a8   :  { %1791 = vmatprep.subr.bf16.mxu1 %v1962_v38 }
0x1562   :  { %v1175_v29 = vpop.f32.mrf.mxu1 }
0x1563   :  { %v1176_v30 = vadd.f32 %v2311_v43, %v1175_v29 }
0x1564   :  { %v1765_v31 = vpop.f32.mrf.mxu1 }
0x1565   :  { %v1182_v32 = vrot.slane %v1176_v30, 4 }
0x1566   :  { %v1178_v33 = vpop.f32.mrf.mxu1 }
0x1567   :  { %1191 = vrot.lane.b32.xlu1 %v1182_v32, %s1961_s12  ;;  %v1184_v35 = vadd.f32 %v1182_v32, %v2317_v51 }
0x1568   :  { %v1766_v34 = vpop.f32.mrf.mxu1 }
0x1569   :  { %v1674_v36 = vmul.f32 -1.442695, %v1184_v35 }
0x156b   :  { %1902 = vpow2.f32 %v1674_v36 }
0x1578   :  { %v1903_v3 = vpop.eup %1902 }
0x1579   :  { %v1188_v37 = vadd.f32 1.0, %v1903_v3 }
0x157b   :  { %1904 = vrcp.f32 %v1188_v37 }
0x1588   :  { %v1905_v40 = vpop.eup %1904 }
0x1589   :  { %v1201_v52 = vsub.f32 1.0, %v1905_v40  ;;  %v1210_v55 = vmul.f32 %v1905_v40, %v1208_v50 }
0x15d9   :  { %v1192_v45 = vpop.permute.xlu1 %1191 }
0x15da   :  { %v1194_v46 = vmul.f32 %v1905_v40, %v1192_v45 }
0x15dc   :  { %1196 = vrot.lane.b32.xlu0 %v1194_v46, %s1961_s12 }
0x164e   :  { %v1197_v47 = vpop.permute.xlu0 %1196 }
0x164f   :  { %v1199_v48 = vadd.f32 %v1197_v47, %v2317_v51 }
0x1651   :  { %1906 = vtanh.f32 %v1199_v48 }
0x165e   :  { %v1907_v49 = vpop.eup %1906 }
0x165f   :  { %1203 = vrot.lane.b32.xlu1 %v1907_v49, %s1964_s2 }
0x16d1   :  { %v1204_v54 = vpop.permute.xlu1 %1203 }
0x16d2   :  { %v1206_v39 = vmul.f32 %v1204_v54, %v1201_v52 }
0x16d4   :  { %v1211_v53 = vadd.f32 %v1210_v55, %v1206_v39 }
0x16d6   :  { %v1212_v56 = vpack.c.bf16 %v1211_v53, %v1211_v53  ;;  %v1287_v20 = vrot.slane %v1211_v53, 6 }
0x16d8   :  { %v1214_v57 = vrot.slane %v1212_v56, 2 }
0x16da   :  { %1215 = vrot.lane.b32.xlu0 %v1214_v57, %s1964_s2 }
0x174c   :  { %v1216_v58 = vpop.permute.xlu0 %1215 }
0x174d   :  { %1772 = vmatmul.mubr.msk.bf16.vlgmr.msra.gmra.mxu0 %vm986_vm8, %v1216_v58 }
0x174e   :  { %1784 = vmatpush3.bf16.msra.mxu0 %v2277_v18  ;;  %1787 = vmatprep.mubr.msk.bf16.mxu0 %vm1963_vm5, %v1962_v38 }
0x174f   :  { %1785 = vmatprep.subr.bf16.mxu0 %v1962_v38 }
0x1752   :  { %1786 = vmatpush3.bf16.msra.mxu0 %v2285_v42 }
0x1753   :  { %1799 = vmatprep.subr.bf16.mxu0 %v1962_v38 }
0x180d   :  { %v1254_v1 = vpop.f32.mrf.mxu0 }
0x180e   :  { %v1255_v59 = vadd.f32 %v2311_v43, %v1254_v1 }
0x180f   :  { %v1773_v60 = vpop.f32.mrf.mxu0 }
0x1810   :  { %v1261_v6 = vrot.slane %v1255_v59, 2 }
0x1811   :  { %v1257_v7 = vpop.f32.mrf.mxu0 }
0x1812   :  { %1270 = vrot.lane.b32.xlu1 %v1261_v6, %s1961_s12  ;;  %v1263_v11 = vadd.f32 %v1261_v6, %v2317_v51 }
0x1813   :  { %v1774_v61 = vpop.f32.mrf.mxu0 }
0x1814   :  { %v1676_v12 = vmul.f32 -1.442695, %v1263_v11 }
0x1816   :  { %1908 = vpow2.f32 %v1676_v12 }
0x1823   :  { %v1909_v14 = vpop.eup %1908 }
0x1824   :  { %v1267_v24 = vadd.f32 1.0, %v1909_v14 }
0x1826   :  { %1910 = vrcp.f32 %v1267_v24 }
0x1833   :  { %v1911_v62 = vpop.eup %1910 }
0x1834   :  { %v1280_v4 = vsub.f32 1.0, %v1911_v62  ;;  %v1289_v5 = vmul.f32 %v1911_v62, %v1287_v20 }
0x1884   :  { %v1271_v27 = vpop.permute.xlu1 %1270 }
0x1885   :  { %v1273_v15 = vmul.f32 %v1911_v62, %v1271_v27 }
0x1887   :  { %1275 = vrot.lane.b32.xlu0 %v1273_v15, %s1961_s12 }
0x18f9   :  { %v1276_v41 = vpop.permute.xlu0 %1275 }
0x18fa   :  { %v1278_v63 = vadd.f32 %v1276_v41, %v2317_v51 }
0x18fc   :  { %1912 = vtanh.f32 %v1278_v63 }
0x1909   :  { %v1913_v2 = vpop.eup %1912 }
0x190a   :  { %1282 = vrot.lane.b32.xlu1 %v1913_v2, %s1964_s2 }
0x197c   :  { %v1283_v22 = vpop.permute.xlu1 %1282 }
0x197d   :  { %v1285_v8 = vmul.f32 %v1283_v22, %v1280_v4 }
0x197f   :  { %v1290_v9 = vadd.f32 %v1289_v5, %v1285_v8 }
0x1981   :  { %v1291_v10 = vpack.c.bf16 %v1290_v9, %v1290_v9  ;;  %v1364_v35 = vrot.slane %v1290_v9, 6 }
0x1983   :  { %v1293_v13 = vrot.slane %v1291_v10, 3 }
0x1985   :  { %1294 = vrot.lane.b32.xlu0 %v1293_v13, %s1964_s2 }
0x19f7   :  { %v1295_v0 = vpop.permute.xlu0 %1294 }
0x19f8   :  { %1780 = vmatmul.mubr.msk.bf16.vlgmr.msra.gmra.mxu1 %vm986_vm8, %v1295_v0 }
0x19f9   :  { %1792 = vmatpush3.bf16.msra.mxu1 %v2277_v18  ;;  %1795 = vmatprep.mubr.msk.bf16.mxu1 %vm1963_vm5, %v1962_v38 }
0x19fa   :  { %1793 = vmatprep.subr.bf16.mxu1 %v1962_v38 }
0x19fd   :  { %1794 = vmatpush3.bf16.msra.mxu1 %v2285_v42 }
0x1ab8   :  { %v1333_v51 = vpop.f32.mrf.mxu1 }
0x1ab9   :  { %v1334_v16 = vadd.f32 %v2311_v43, %v1333_v51 }
0x1aba   :  { %v1781_v17 = vpop.f32.mrf.mxu1 }
0x1abb   :  { %1347 = vrot.lane.b32.xlu1 %v1334_v16, %s1961_s12  ;;  %v1339_v21 = vadd.f32 %v1334_v16, %v2313_v44 }
0x1abc   :  { %v1336_v26 = vpop.f32.mrf.mxu1 }
0x1abd   :  { %v1678_v23 = vmul.f32 -1.442695, %v1339_v21 }
0x1abe   :  { %v1782_v19 = vpop.f32.mrf.mxu1 }
0x1abf   :  { %1914 = vpow2.f32 %v1678_v23 }
0x1acc   :  { %v1915_v25 = vpop.eup %1914 }
0x1acd   :  { %v1343_v28 = vadd.f32 1.0, %v1915_v25 }
0x1acf   :  { %1916 = vrcp.f32 %v1343_v28 }
0x1adc   :  { %v1917_v29 = vpop.eup %1916 }
0x1add   :  { %v1357_v36 = vsub.f32 1.0, %v1917_v29  ;;  %v1366_v37 = vmul.f32 %v1917_v29, %v1364_v35 }
0x1b2d   :  { %v1348_v30 = vpop.permute.xlu1 %1347 }
0x1b2e   :  { %v1350_v31 = vmul.f32 %v1917_v29, %v1348_v30 }
0x1b30   :  { %1352 = vrot.lane.b32.xlu0 %v1350_v31, %s1961_s12 }
0x1ba2   :  { %v1353_v32 = vpop.permute.xlu0 %1352 }
0x1ba3   :  { %v1355_v33 = vadd.f32 %v1353_v32, %v2313_v44 }
0x1ba5   :  { %1918 = vtanh.f32 %v1355_v33 }
0x1bb2   :  { %v1919_v34 = vpop.eup %1918 }
0x1bb3   :  { %1359 = vrot.lane.b32.xlu1 %v1919_v34, %s1964_s2 }
0x1c25   :  { %v1360_v3 = vpop.permute.xlu1 %1359 }
0x1c26   :  { %v1362_v40 = vmul.f32 %v1360_v3, %v1357_v36 }
0x1c28   :  { %v1367_v45 = vadd.f32 %v1366_v37, %v1362_v40 }
0x1c2a   :  { %v1368_v46 = vpack.c.bf16 %v1367_v45, %v1367_v45  ;;  %v1442_v60 = vrot.slane %v1367_v45, 6 }
0x1c2c   :  { %1370 = vrot.lane.b32.xlu0 %v1368_v46, %s1964_s2 }
0x1c9e   :  { %v1371_v47 = vpop.permute.xlu0 %1370 }
0x1c9f   :  { %1788 = vmatmul.mubr.msk.bf16.vlgmr.msra.gmra.mxu0 %vm986_vm8, %v1371_v47 }
0x1ca0   :  { %1800 = vmatpush3.bf16.msra.mxu0 %v2277_v18  ;;  %1803 = vmatprep.mubr.msk.bf16.mxu0 %vm1963_vm5, %v1962_v38 }
0x1ca1   :  { %1801 = vmatprep.subr.bf16.mxu0 %v1962_v38 }
0x1ca4   :  { %1802 = vmatpush3.bf16.msra.mxu0 %v2285_v42 }
0x1d5f   :  { %v1409_v48 = vpop.f32.mrf.mxu0 }
0x1d60   :  { %v1410_v49 = vadd.f32 %v2311_v43, %v1409_v48 }
0x1d61   :  { %v1789_v50 = vpop.f32.mrf.mxu0 }
0x1d62   :  { %v1416_v52 = vrot.slane %v1410_v49, 6 }
0x1d63   :  { %v1412_v54 = vpop.f32.mrf.mxu0 }
0x1d64   :  { %1425 = vrot.lane.b32.xlu1 %v1416_v52, %s1961_s12  ;;  %v1418_v39 = vadd.f32 %v1416_v52, %v2313_v44 }
0x1d65   :  { %v1790_v55 = vpop.f32.mrf.mxu0 }
0x1d66   :  { %v1680_v53 = vmul.f32 -1.442695, %v1418_v39 }
0x1d68   :  { %1920 = vpow2.f32 %v1680_v53 }
0x1d75   :  { %v1921_v18 = vpop.eup %1920 }
0x1d76   :  { %v1422_v56 = vadd.f32 1.0, %v1921_v18 }
0x1d78   :  { %1922 = vrcp.f32 %v1422_v56 }
0x1d85   :  { %v1923_v57 = vpop.eup %1922 }
0x1d86   :  { %v1435_v6 = vsub.f32 1.0, %v1923_v57  ;;  %v1444_v61 = vmul.f32 %v1923_v57, %v1442_v60 }
0x1dd6   :  { %v1426_v38 = vpop.permute.xlu1 %1425 }
0x1dd7   :  { %v1428_v58 = vmul.f32 %v1923_v57, %v1426_v38 }
0x1dd9   :  { %1430 = vrot.lane.b32.xlu0 %v1428_v58, %s1961_s12 }
0x1e4b   :  { %v1431_v42 = vpop.permute.xlu0 %1430 }
0x1e4c   :  { %v1433_v1 = vadd.f32 %v1431_v42, %v2313_v44 }
0x1e4e   :  { %1924 = vtanh.f32 %v1433_v1 }
0x1e5b   :  { %v1925_v59 = vpop.eup %1924 }
0x1e5c   :  { %1437 = vrot.lane.b32.xlu1 %v1925_v59, %s1964_s2 }
0x1ece   :  { %v1438_v7 = vpop.permute.xlu1 %1437 }
0x1ecf   :  { %v1440_v11 = vmul.f32 %v1438_v7, %v1435_v6 }
0x1ed1   :  { %v1445_v12 = vadd.f32 %v1444_v61, %v1440_v11 }
0x1ed3   :  { %v1446_v14 = vpack.c.bf16 %v1445_v12, %v1445_v12  ;;  %v1521_v17 = vrot.slane %v1445_v12, 6 }
0x1ed5   :  { %v1448_v24 = vrot.slane %v1446_v14, 1 }
0x1ed7   :  { %1449 = vrot.lane.b32.xlu0 %v1448_v24, %s1964_s2 }
0x1f49   :  { %v1450_v62 = vpop.permute.xlu0 %1449 }
0x1f4a   :  { %1796 = vmatmul.mubr.msk.bf16.vlgmr.msra.gmra.mxu1 %vm986_vm8, %v1450_v62 }
0x200a   :  { %v1488_v27 = vpop.f32.mrf.mxu1 }
0x200b   :  { %v1489_v15 = vadd.f32 %v2311_v43, %v1488_v27 }
0x200c   :  { %v1797_v41 = vpop.f32.mrf.mxu1 }
0x200d   :  { %v1495_v63 = vrot.slane %v1489_v15, 4 }
0x200e   :  { %v1491_v2 = vpop.f32.mrf.mxu1 }
0x200f   :  { %1504 = vrot.lane.b32.xlu1 %v1495_v63, %s1961_s12  ;;  %v1497_v4 = vadd.f32 %v1495_v63, %v2313_v44 }
0x2010   :  { %v1798_v20 = vpop.f32.mrf.mxu1 }
0x2011   :  { %v1682_v22 = vmul.f32 -1.442695, %v1497_v4 }
0x2013   :  { %1926 = vpow2.f32 %v1682_v22 }
0x2020   :  { %v1927_v5 = vpop.eup %1926 }
0x2021   :  { %v1501_v8 = vadd.f32 1.0, %v1927_v5 }
0x2023   :  { %1928 = vrcp.f32 %v1501_v8 }
0x2030   :  { %v1929_v9 = vpop.eup %1928 }
0x2031   :  { %v1514_v26 = vsub.f32 1.0, %v1929_v9  ;;  %v1523_v21 = vmul.f32 %v1929_v9, %v1521_v17 }
0x2081   :  { %v1505_v10 = vpop.permute.xlu1 %1504 }
0x2082   :  { %v1507_v13 = vmul.f32 %v1929_v9, %v1505_v10 }
0x2084   :  { %1509 = vrot.lane.b32.xlu0 %v1507_v13, %s1961_s12 }
0x20f6   :  { %v1510_v0 = vpop.permute.xlu0 %1509 }
0x20f7   :  { %v1512_v51 = vadd.f32 %v1510_v0, %v2313_v44 }
0x20f9   :  { %1930 = vtanh.f32 %v1512_v51 }
0x2106   :  { %v1931_v16 = vpop.eup %1930 }
0x2107   :  { %1516 = vrot.lane.b32.xlu1 %v1931_v16, %s1964_s2 }
0x2179   :  { %v1517_v19 = vpop.permute.xlu1 %1516 }
0x217a   :  { %v1519_v23 = vmul.f32 %v1517_v19, %v1514_v26 }
0x217c   :  { %v1524_v25 = vadd.f32 %v1523_v21, %v1519_v23 }
0x217e   :  { %v1525_v28 = vpack.c.bf16 %v1524_v25, %v1524_v25  ;;  %v1600_v52 = vrot.slane %v1524_v25, 6 }
0x2180   :  { %v1527_v29 = vrot.slane %v1525_v28, 2 }
0x2182   :  { %1528 = vrot.lane.b32.xlu0 %v1527_v29, %s1964_s2 }
0x21f4   :  { %v1529_v30 = vpop.permute.xlu0 %1528 }
0x21f5   :  { %1804 = vmatmul.mubr.msk.bf16.vlgmr.msra.gmra.mxu0 %vm986_vm8, %v1529_v30 }
0x22b5   :  { %v1567_v31 = vpop.f32.mrf.mxu0 }
0x22b6   :  { %v1568_v32 = vadd.f32 %v2311_v43, %v1567_v31 }
0x22b7   :  { %v1805_v33 = vpop.f32.mrf.mxu0 }
0x22b8   :  { %v1574_v34 = vrot.slane %v1568_v32, 2 }
0x22b9   :  { %v1570_v35 = vpop.f32.mrf.mxu0 }
0x22ba   :  { %1583 = vrot.lane.b32.xlu1 %v1574_v34, %s1961_s12  ;;  %v1576_v3 = vadd.f32 %v1574_v34, %v2313_v44 }
0x22bb   :  { %v1806_v36 = vpop.f32.mrf.mxu0 }
0x22bc   :  { %v1684_v37 = vmul.f32 -1.442695, %v1576_v3 }
0x22be   :  { %1932 = vpow2.f32 %v1684_v37 }
0x22cb   :  { %v1933_v40 = vpop.eup %1932 }
0x22cc   :  { %v1580_v45 = vadd.f32 1.0, %v1933_v40 }
0x22ce   :  { %1934 = vrcp.f32 %v1580_v45 }
0x22db   :  { %v1935_v46 = vpop.eup %1934 }
0x22dc   :  { %v1593_v54 = vsub.f32 1.0, %v1935_v46  ;;  %v1602_v39 = vmul.f32 %v1935_v46, %v1600_v52 }
0x232c   :  { %v1584_v47 = vpop.permute.xlu1 %1583 }
0x232d   :  { %v1586_v48 = vmul.f32 %v1935_v46, %v1584_v47 }
0x232f   :  { %1588 = vrot.lane.b32.xlu0 %v1586_v48, %s1961_s12 }
0x23a1   :  { %v1589_v49 = vpop.permute.xlu0 %1588 }
0x23a2   :  { %v1591_v43 = vadd.f32 %v1589_v49, %v2313_v44 }
0x23a4   :  { %1936 = vtanh.f32 %v1591_v43 }
0x23b1   :  { %v1937_v50 = vpop.eup %1936 }
0x23b2   :  { %1595 = vrot.lane.b32.xlu1 %v1937_v50, %s1964_s2 }
0x2424   :  { %v1596_v55 = vpop.permute.xlu1 %1595 }
0x2425   :  { %v1598_v53 = vmul.f32 %v1596_v55, %v1593_v54 }
0x2427   :  { %v1603_v18 = vadd.f32 %v1602_v39, %v1598_v53 }
0x2429   :  { %1606 = vrot.lane.b32.xlu0 %v1603_v18, %s1965_s0 }
0x249b   :  { %v1607_v56 = vpop.permute.xlu0 %1606 }
0x249c   :  { %1610 = vst.msk [vmem:[#allocation4 - $0x6] sm:$0xc0] %vm1609_vm9, %v1607_v56 }
0x249d   :  { %1949 = shalt.err (!%p1946_p4)
}
0x249e   :  { %1620 = dma.vmem_to_hbm [thread:$0]  %s1618_s10, 32, %s2413_s3, [#allocation5]  }
0x249f   :  { %1958 = dma.done.wait [#allocation5], 32  }
0x24a0   :  { %1959 = vsyncadd [#allocation5], 4294967264 }
0x24a1   :  { %1624 = vsyncpa [#allocation5], 1 }

</bundles_post_ra>
